<compile_context>
chip_gen: v6e
topology: v6e:2x2x1
jax: 0.10.0
libtpu: 0.0.40
codegen_flags: <defaults>
</compile_context>

<pallas_src>
import functools

import numpy as np
import jax
import jax.numpy as jnp
from jax.experimental import pallas as pl
from jax.experimental.pallas import tpu as pltpu


# ---------------------------------------------------------------------------
# Verbatim port of the PyTorch helper
# ---------------------------------------------------------------------------
def generate_masks(num):
    masks = []
    for i in range(num):
        now = list(range(2 ** num))
        length = 2 ** (num - i)
        for j in range(2 ** i):
            tmp = now[j * length:j * length + length // 2]
            now[j * length:j * length + length // 2] = \
                now[j * length + length // 2:j * length + length]
            now[j * length + length // 2:j * length + length] = tmp
        masks.append(now)
    return masks


# ---------------------------------------------------------------------------
# Parameters (deterministic init; Conv2d has bias by default)
# ---------------------------------------------------------------------------
def init_butterfly_v3_params(in_channels, key):
    c = in_channels
    s = int(round(np.log2(c)))
    assert 2 ** s == c and s >= 1, "channels must be a power of two >= 2"

    masks = generate_masks(s)
    perms = np.zeros((s, c, c), np.float32)
    for i, m in enumerate(masks):
        perms[i, np.arange(c), np.asarray(m)] = 1.0     # shuffled[c] = last[m[c]]

    kw, kb = jax.random.split(key)
    w = jax.random.normal(kw, (2 * s, c, 3, 3), jnp.float32) * (1.0 / 3.0)
    b = jax.random.normal(kb, (2 * s, c), jnp.float32) * 0.1

    # Pack per depthwise conv as (C, 10): 9 taps (row-major ky,kx) + bias column.
    wb = jnp.concatenate([w.reshape(2 * s, c, 9), b[:, :, None]], axis=-1)

    return {"wb": wb, "perms": jnp.asarray(perms),
            "w": w, "b": b, "masks": masks, "num_stages": s}


# ---------------------------------------------------------------------------
# Pallas kernel: all butterfly stages fused, one batch element per grid step
# ---------------------------------------------------------------------------
def _butterfly_v3_kernel(x_ref, wb_ref, perm_ref, tapmask_ref, o_ref, *,
                         C, H, W, dilation, num_stages, skip):
    # x_ref:       (1, C, H*W)   channels on sublanes, flattened spatial on lanes
    # wb_ref:      (2S, C, 10)   per depthwise conv: 9 taps + bias (column 9)
    # perm_ref:    (S, C, C)     0/1 channel-shuffle permutation matrices
    # tapmask_ref: (9, 1, H*W)   per-tap spatial validity mask (zero padding)
    HW = H * W

    # Static per-tap spatial offsets in the flattened (lane) axis.
    offsets = []
    for ky in range(3):
        for kx in range(3):
            offsets.append(((ky - 1) * dilation) * W + (kx - 1) * dilation)

    # Hoist the 9 tap masks (shared by every conv of every stage).
    tapmasks = [tapmask_ref[t] for t in range(9)]       # each (1, HW)

    def dwconv(h, conv_idx):
        # Depthwise dilated 3x3 conv with zero padding: 9 masked
        # shift-multiply-accumulate passes (lane roll + VPU mul/add).
        wb = wb_ref[conv_idx].astype(jnp.float32)       # (C, 10)
        acc = jnp.zeros((C, HW), jnp.float32)
        for t in range(9):
            off = offsets[t]
            if off % HW == 0:
                src = h
            else:
                src = pltpu.roll(h, shift=(-off) % HW, axis=1)
            acc = acc + (src * tapmasks[t]) * wb[:, t:t + 1]
        return acc + wb[:, 9:10]                        # + per-channel bias

    last = x_ref[0].astype(jnp.float32)                 # (C, HW)
    for i in range(num_stages):
        # Butterfly channel shuffle via a tiny static permutation matmul (idle MXU).
        shuffled = jnp.dot(perm_ref[i], last, preferred_element_type=jnp.float32)
        now = dwconv(last, 2 * i) + dwconv(shuffled, 2 * i + 1)
        if skip:
            now = now + last
        last = now

    out = jnp.maximum(last, 0.0)                        # act = ReLU (see TODO above)
    out = out + x_ref[0].astype(jnp.float32)            # final residual (re-read)
    o_ref[0] = out.astype(o_ref.dtype)


def butterfly_conv_v3_pallas(x_nchw, params, *, dilation=1, skip_connection=True):
    wb, perms = params["wb"], params["perms"]
    n, c, h, w = x_nchw.shape
    hw = h * w
    s = int(perms.shape[0])

    # Free reshape (no transpose): NCHW -> (N, C, H*W).
    x_flat = x_nchw.reshape(n, c, hw)

    # Per-tap spatial validity masks (zero padding), built once on the host.
    hh, ww = np.meshgrid(np.arange(h), np.arange(w), indexing="ij")
    mask_list = []
    for ky in range(3):
        dy = (ky - 1) * dilation
        for kx in range(3):
            dx = (kx - 1) * dilation
            valid = ((hh + dy >= 0) & (hh + dy < h) &
                     (ww + dx >= 0) & (ww + dx < w))
            mask_list.append(valid.reshape(1, hw))
    tapmask = jnp.asarray(np.stack(mask_list, axis=0).astype(np.float32))  # (9,1,HW)

    kernel = functools.partial(_butterfly_v3_kernel, C=c, H=h, W=w,
                               dilation=dilation, num_stages=s,
                               skip=skip_connection)

    # Explicit VMEM budget: double-buffered in/out image blocks + constant blocks,
    # capped below v7x's 64 MiB physical VMEM.
    block_bytes = c * hw * 4
    const_bytes = (wb.size + perms.size + tapmask.size) * 4
    vmem_limit = int(min(48 * 1024 * 1024,
                         max(16 * 1024 * 1024, 8 * block_bytes + 4 * const_bytes)))

    out_flat = pl.pallas_call(
        kernel,
        out_shape=jax.ShapeDtypeStruct((n, c, hw), x_nchw.dtype),
        grid=(n,),
        in_specs=[
            pl.BlockSpec((1, c, hw), lambda i: (i, 0, 0)),
            pl.BlockSpec(tuple(wb.shape), lambda i: (0, 0, 0)),       # resident
            pl.BlockSpec(tuple(perms.shape), lambda i: (0, 0, 0)),    # resident
            pl.BlockSpec(tuple(tapmask.shape), lambda i: (0, 0, 0)),  # resident
        ],
        out_specs=pl.BlockSpec((1, c, hw), lambda i: (i, 0, 0)),
        compiler_params=pltpu.CompilerParams(
            dimension_semantics=("parallel",),
            vmem_limit_bytes=vmem_limit),
    )(x_flat, wb, perms, tapmask)

    return out_flat.reshape(n, c, h, w)


# ---------------------------------------------------------------------------
# Pure-JAX reference (mirrors the PyTorch forward) for verification
# ---------------------------------------------------------------------------
def _dwconv_ref(x, w, b, dilation):
    # x: (N,C,H,W); w: (C,3,3); b: (C,)  depthwise, stride 1, padding=dilation.
    n, c, h, wd = x.shape
    d = dilation
    xp = jnp.pad(x, ((0, 0), (0, 0), (d, d), (d, d)))
    out = jnp.zeros_like(x)
    for ky in range(3):
        for kx in range(3):
            patch = xp[:, :, ky * d: ky * d + h, kx * d: kx * d + wd]
            out = out + patch * w[None, :, ky, kx, None, None]
    return out + b[None, :, None, None]


def butterfly_conv_v3_ref(x, params, *, dilation=1, skip_connection=True):
    w, b, masks = params["w"], params["b"], params["masks"]
    x0 = x.astype(jnp.float32)
    last = x0
    for i, m in enumerate(masks):
        shuffled = last[:, jnp.asarray(m), :, :]
        now = (_dwconv_ref(last, w[2 * i], b[2 * i], dilation) +
               _dwconv_ref(shuffled, w[2 * i + 1], b[2 * i + 1], dilation))
        if skip_connection:
            now = now + last
        last = now
    out = jnp.maximum(last, 0.0) + x0
    return out.astype(x.dtype)


# ---------------------------------------------------------------------------
# Thin module-like wrapper
# ---------------------------------------------------------------------------
class ButterflyConvV3:
    def __init__(self, in_channels, out_channels, dilation=1,
                 skip_connection=True, seed=0):
        assert in_channels == out_channels, \
            "only the Identity head/tail branch (in==out) is implemented"
        self.dilation = dilation
        self.skip_connection = skip_connection
        self.params = init_butterfly_v3_params(in_channels,
                                               jax.random.PRNGKey(seed + 1))

    def __call__(self, x_nchw):
        return butterfly_conv_v3_pallas(x_nchw, self.params,
                                        dilation=self.dilation,
                                        skip_connection=self.skip_connection)


if __name__ == "__main__":
    key = jax.random.PRNGKey(0)
    N, C, H, W = 2, 4, 16, 16          # power-of-2 channels -> 2 butterfly stages
    DILATION = 1

    x = jax.random.normal(key, (N, C, H, W), jnp.float32)

    block = ButterflyConvV3(C, C, dilation=DILATION, skip_connection=True, seed=0)

    out = block(x)
    out = jax.block_until_ready(out)

    ref = butterfly_conv_v3_ref(x, block.params, dilation=DILATION,
                                skip_connection=True)
    np.testing.assert_allclose(np.asarray(out), np.asarray(ref),
                               rtol=1e-4, atol=1e-4)
    assert out.shape == (N, C, H, W)
    print("KERNEL_OK")
</pallas_src>

<mosaic_0001>
module attributes {stable_mosaic.version = 11 : i64} {
  func.func @_butterfly_v3_kernel(%arg0: i32, %arg1: memref<1x4x256xf32, #tpu.memory_space<vmem>>, %arg2: memref<4x4x10xf32, #tpu.memory_space<vmem>>, %arg3: memref<2x4x4xf32, #tpu.memory_space<vmem>>, %arg4: memref<9x1x256xf32, #tpu.memory_space<vmem>>, %arg5: memref<1x4x256xf32, #tpu.memory_space<vmem>>) attributes {dimension_semantics = [#tpu.dimension_semantics<parallel>], iteration_bounds = array<i64: 2>, scalar_prefetch = 0 : i64, scratch_operands = 0 : i64, tpu.core_type = #tpu.core_type<tc>, window_params = [{transform_indices = @transform_0, window_bounds = array<i64: 1, 4, 256>}, {pipeline_mode = #tpu.pipeline_mode<synchronous>, transform_indices = @transform_1, window_bounds = array<i64: 4, 4, 10>}, {pipeline_mode = #tpu.pipeline_mode<synchronous>, transform_indices = @transform_2, window_bounds = array<i64: 2, 4, 4>}, {pipeline_mode = #tpu.pipeline_mode<synchronous>, transform_indices = @transform_3, window_bounds = array<i64: 9, 1, 256>}, {transform_indices = @transform_4, window_bounds = array<i64: 1, 4, 256>}]} {
    %c0 = arith.constant 0 : index
    %c0_0 = arith.constant 0 : index
    %c0_1 = arith.constant 0 : index
    %0 = vector.load %arg4[%c0, %c0_0, %c0_1] : memref<9x1x256xf32, #tpu.memory_space<vmem>>, vector<1x1x256xf32>
    %1 = vector.shape_cast %0 : vector<1x1x256xf32> to vector<1x256xf32>
    %c1 = arith.constant 1 : index
    %c0_2 = arith.constant 0 : index
    %c0_3 = arith.constant 0 : index
    %2 = vector.load %arg4[%c1, %c0_2, %c0_3] : memref<9x1x256xf32, #tpu.memory_space<vmem>>, vector<1x1x256xf32>
    %3 = vector.shape_cast %2 : vector<1x1x256xf32> to vector<1x256xf32>
    %c2 = arith.constant 2 : index
    %c0_4 = arith.constant 0 : index
    %c0_5 = arith.constant 0 : index
    %4 = vector.load %arg4[%c2, %c0_4, %c0_5] : memref<9x1x256xf32, #tpu.memory_space<vmem>>, vector<1x1x256xf32>
    %5 = vector.shape_cast %4 : vector<1x1x256xf32> to vector<1x256xf32>
    %c3 = arith.constant 3 : index
    %c0_6 = arith.constant 0 : index
    %c0_7 = arith.constant 0 : index
    %6 = vector.load %arg4[%c3, %c0_6, %c0_7] : memref<9x1x256xf32, #tpu.memory_space<vmem>>, vector<1x1x256xf32>
    %7 = vector.shape_cast %6 : vector<1x1x256xf32> to vector<1x256xf32>
    %c4 = arith.constant 4 : index
    %c0_8 = arith.constant 0 : index
    %c0_9 = arith.constant 0 : index
    %8 = vector.load %arg4[%c4, %c0_8, %c0_9] : memref<9x1x256xf32, #tpu.memory_space<vmem>>, vector<1x1x256xf32>
    %9 = vector.shape_cast %8 : vector<1x1x256xf32> to vector<1x256xf32>
    %c5 = arith.constant 5 : index
    %c0_10 = arith.constant 0 : index
    %c0_11 = arith.constant 0 : index
    %10 = vector.load %arg4[%c5, %c0_10, %c0_11] : memref<9x1x256xf32, #tpu.memory_space<vmem>>, vector<1x1x256xf32>
    %11 = vector.shape_cast %10 : vector<1x1x256xf32> to vector<1x256xf32>
    %c6 = arith.constant 6 : index
    %c0_12 = arith.constant 0 : index
    %c0_13 = arith.constant 0 : index
    %12 = vector.load %arg4[%c6, %c0_12, %c0_13] : memref<9x1x256xf32, #tpu.memory_space<vmem>>, vector<1x1x256xf32>
    %13 = vector.shape_cast %12 : vector<1x1x256xf32> to vector<1x256xf32>
    %c7 = arith.constant 7 : index
    %c0_14 = arith.constant 0 : index
    %c0_15 = arith.constant 0 : index
    %14 = vector.load %arg4[%c7, %c0_14, %c0_15] : memref<9x1x256xf32, #tpu.memory_space<vmem>>, vector<1x1x256xf32>
    %15 = vector.shape_cast %14 : vector<1x1x256xf32> to vector<1x256xf32>
    %c8 = arith.constant 8 : index
    %c0_16 = arith.constant 0 : index
    %c0_17 = arith.constant 0 : index
    %16 = vector.load %arg4[%c8, %c0_16, %c0_17] : memref<9x1x256xf32, #tpu.memory_space<vmem>>, vector<1x1x256xf32>
    %17 = vector.shape_cast %16 : vector<1x1x256xf32> to vector<1x256xf32>
    %c0_18 = arith.constant 0 : index
    %c0_19 = arith.constant 0 : index
    %c0_20 = arith.constant 0 : index
    %18 = vector.load %arg1[%c0_18, %c0_19, %c0_20] : memref<1x4x256xf32, #tpu.memory_space<vmem>>, vector<1x4x256xf32>
    %19 = vector.shape_cast %18 : vector<1x4x256xf32> to vector<4x256xf32>
    %c0_21 = arith.constant 0 : index
    %c0_22 = arith.constant 0 : index
    %c0_23 = arith.constant 0 : index
    %20 = vector.load %arg3[%c0_21, %c0_22, %c0_23] : memref<2x4x4xf32, #tpu.memory_space<vmem>>, vector<1x4x4xf32>
    %21 = vector.shape_cast %20 : vector<1x4x4xf32> to vector<4x4xf32>
    %cst = arith.constant dense<0.000000e+00> : vector<4x256xf32>
    %22 = tpu.matmul %21, %19, %cst {dimension_numbers = #tpu.dot_dimension_numbers<[1], [0], [0], [1], [0, 0, 1, 1], [], []>} : vector<4x4xf32>, vector<4x256xf32>, vector<4x256xf32> -> vector<4x256xf32>
    %c0_24 = arith.constant 0 : index
    %c0_25 = arith.constant 0 : index
    %c0_26 = arith.constant 0 : index
    %23 = vector.load %arg2[%c0_24, %c0_25, %c0_26] : memref<4x4x10xf32, #tpu.memory_space<vmem>>, vector<1x4x10xf32>
    %24 = vector.shape_cast %23 : vector<1x4x10xf32> to vector<4x10xf32>
    %cst_27 = arith.constant 0.000000e+00 : f32
    %25 = vector.broadcast %cst_27 : f32 to vector<4x256xf32>
    %c17_i32 = arith.constant 17 : i32
    %26 = tpu.dynamic_rotate %19 by %c17_i32 dim 1 : vector<4x256xf32>, i32 -> vector<4x256xf32>
    %27 = vector.broadcast %1 : vector<1x256xf32> to vector<4x256xf32>
    %28 = arith.mulf %26, %27 : vector<4x256xf32>
    %29 = vector.extract_strided_slice %24 {offsets = [0, 0], sizes = [4, 1], strides = [1, 1]} : vector<4x10xf32> to vector<4x1xf32>
    %30 = vector.broadcast %29 : vector<4x1xf32> to vector<4x256xf32>
    %31 = arith.mulf %28, %30 : vector<4x256xf32>
    %32 = arith.addf %25, %31 : vector<4x256xf32>
    %c16_i32 = arith.constant 16 : i32
    %33 = tpu.dynamic_rotate %19 by %c16_i32 dim 1 : vector<4x256xf32>, i32 -> vector<4x256xf32>
    %34 = vector.broadcast %3 : vector<1x256xf32> to vector<4x256xf32>
    %35 = arith.mulf %33, %34 : vector<4x256xf32>
    %36 = vector.extract_strided_slice %24 {offsets = [0, 1], sizes = [4, 1], strides = [1, 1]} : vector<4x10xf32> to vector<4x1xf32>
    %37 = vector.broadcast %36 : vector<4x1xf32> to vector<4x256xf32>
    %38 = arith.mulf %35, %37 : vector<4x256xf32>
    %39 = arith.addf %32, %38 : vector<4x256xf32>
    %c15_i32 = arith.constant 15 : i32
    %40 = tpu.dynamic_rotate %19 by %c15_i32 dim 1 : vector<4x256xf32>, i32 -> vector<4x256xf32>
    %41 = vector.broadcast %5 : vector<1x256xf32> to vector<4x256xf32>
    %42 = arith.mulf %40, %41 : vector<4x256xf32>
    %43 = vector.extract_strided_slice %24 {offsets = [0, 2], sizes = [4, 1], strides = [1, 1]} : vector<4x10xf32> to vector<4x1xf32>
    %44 = vector.broadcast %43 : vector<4x1xf32> to vector<4x256xf32>
    %45 = arith.mulf %42, %44 : vector<4x256xf32>
    %46 = arith.addf %39, %45 : vector<4x256xf32>
    %c1_i32 = arith.constant 1 : i32
    %47 = tpu.dynamic_rotate %19 by %c1_i32 dim 1 : vector<4x256xf32>, i32 -> vector<4x256xf32>
    %48 = vector.broadcast %7 : vector<1x256xf32> to vector<4x256xf32>
    %49 = arith.mulf %47, %48 : vector<4x256xf32>
    %50 = vector.extract_strided_slice %24 {offsets = [0, 3], sizes = [4, 1], strides = [1, 1]} : vector<4x10xf32> to vector<4x1xf32>
    %51 = vector.broadcast %50 : vector<4x1xf32> to vector<4x256xf32>
    %52 = arith.mulf %49, %51 : vector<4x256xf32>
    %53 = arith.addf %46, %52 : vector<4x256xf32>
    %54 = vector.broadcast %9 : vector<1x256xf32> to vector<4x256xf32>
    %55 = arith.mulf %19, %54 : vector<4x256xf32>
    %56 = vector.extract_strided_slice %24 {offsets = [0, 4], sizes = [4, 1], strides = [1, 1]} : vector<4x10xf32> to vector<4x1xf32>
    %57 = vector.broadcast %56 : vector<4x1xf32> to vector<4x256xf32>
    %58 = arith.mulf %55, %57 : vector<4x256xf32>
    %59 = arith.addf %53, %58 : vector<4x256xf32>
    %c255_i32 = arith.constant 255 : i32
    %60 = tpu.dynamic_rotate %19 by %c255_i32 dim 1 : vector<4x256xf32>, i32 -> vector<4x256xf32>
    %61 = vector.broadcast %11 : vector<1x256xf32> to vector<4x256xf32>
    %62 = arith.mulf %60, %61 : vector<4x256xf32>
    %63 = vector.extract_strided_slice %24 {offsets = [0, 5], sizes = [4, 1], strides = [1, 1]} : vector<4x10xf32> to vector<4x1xf32>
    %64 = vector.broadcast %63 : vector<4x1xf32> to vector<4x256xf32>
    %65 = arith.mulf %62, %64 : vector<4x256xf32>
    %66 = arith.addf %59, %65 : vector<4x256xf32>
    %c241_i32 = arith.constant 241 : i32
    %67 = tpu.dynamic_rotate %19 by %c241_i32 dim 1 : vector<4x256xf32>, i32 -> vector<4x256xf32>
    %68 = vector.broadcast %13 : vector<1x256xf32> to vector<4x256xf32>
    %69 = arith.mulf %67, %68 : vector<4x256xf32>
    %70 = vector.extract_strided_slice %24 {offsets = [0, 6], sizes = [4, 1], strides = [1, 1]} : vector<4x10xf32> to vector<4x1xf32>
    %71 = vector.broadcast %70 : vector<4x1xf32> to vector<4x256xf32>
    %72 = arith.mulf %69, %71 : vector<4x256xf32>
    %73 = arith.addf %66, %72 : vector<4x256xf32>
    %c240_i32 = arith.constant 240 : i32
    %74 = tpu.dynamic_rotate %19 by %c240_i32 dim 1 : vector<4x256xf32>, i32 -> vector<4x256xf32>
    %75 = vector.broadcast %15 : vector<1x256xf32> to vector<4x256xf32>
    %76 = arith.mulf %74, %75 : vector<4x256xf32>
    %77 = vector.extract_strided_slice %24 {offsets = [0, 7], sizes = [4, 1], strides = [1, 1]} : vector<4x10xf32> to vector<4x1xf32>
    %78 = vector.broadcast %77 : vector<4x1xf32> to vector<4x256xf32>
    %79 = arith.mulf %76, %78 : vector<4x256xf32>
    %80 = arith.addf %73, %79 : vector<4x256xf32>
    %c239_i32 = arith.constant 239 : i32
    %81 = tpu.dynamic_rotate %19 by %c239_i32 dim 1 : vector<4x256xf32>, i32 -> vector<4x256xf32>
    %82 = vector.broadcast %17 : vector<1x256xf32> to vector<4x256xf32>
    %83 = arith.mulf %81, %82 : vector<4x256xf32>
    %84 = vector.extract_strided_slice %24 {offsets = [0, 8], sizes = [4, 1], strides = [1, 1]} : vector<4x10xf32> to vector<4x1xf32>
    %85 = vector.broadcast %84 : vector<4x1xf32> to vector<4x256xf32>
    %86 = arith.mulf %83, %85 : vector<4x256xf32>
    %87 = arith.addf %80, %86 : vector<4x256xf32>
    %88 = vector.extract_strided_slice %24 {offsets = [0, 9], sizes = [4, 1], strides = [1, 1]} : vector<4x10xf32> to vector<4x1xf32>
    %89 = vector.broadcast %88 : vector<4x1xf32> to vector<4x256xf32>
    %90 = arith.addf %87, %89 : vector<4x256xf32>
    %c1_28 = arith.constant 1 : index
    %c0_29 = arith.constant 0 : index
    %c0_30 = arith.constant 0 : index
    %91 = vector.load %arg2[%c1_28, %c0_29, %c0_30] : memref<4x4x10xf32, #tpu.memory_space<vmem>>, vector<1x4x10xf32>
    %92 = vector.shape_cast %91 : vector<1x4x10xf32> to vector<4x10xf32>
    %cst_31 = arith.constant 0.000000e+00 : f32
    %93 = vector.broadcast %cst_31 : f32 to vector<4x256xf32>
    %c17_i32_32 = arith.constant 17 : i32
    %94 = tpu.dynamic_rotate %22 by %c17_i32_32 dim 1 : vector<4x256xf32>, i32 -> vector<4x256xf32>
    %95 = vector.broadcast %1 : vector<1x256xf32> to vector<4x256xf32>
    %96 = arith.mulf %94, %95 : vector<4x256xf32>
    %97 = vector.extract_strided_slice %92 {offsets = [0, 0], sizes = [4, 1], strides = [1, 1]} : vector<4x10xf32> to vector<4x1xf32>
    %98 = vector.broadcast %97 : vector<4x1xf32> to vector<4x256xf32>
    %99 = arith.mulf %96, %98 : vector<4x256xf32>
    %100 = arith.addf %93, %99 : vector<4x256xf32>
    %c16_i32_33 = arith.constant 16 : i32
    %101 = tpu.dynamic_rotate %22 by %c16_i32_33 dim 1 : vector<4x256xf32>, i32 -> vector<4x256xf32>
    %102 = vector.broadcast %3 : vector<1x256xf32> to vector<4x256xf32>
    %103 = arith.mulf %101, %102 : vector<4x256xf32>
    %104 = vector.extract_strided_slice %92 {offsets = [0, 1], sizes = [4, 1], strides = [1, 1]} : vector<4x10xf32> to vector<4x1xf32>
    %105 = vector.broadcast %104 : vector<4x1xf32> to vector<4x256xf32>
    %106 = arith.mulf %103, %105 : vector<4x256xf32>
    %107 = arith.addf %100, %106 : vector<4x256xf32>
    %c15_i32_34 = arith.constant 15 : i32
    %108 = tpu.dynamic_rotate %22 by %c15_i32_34 dim 1 : vector<4x256xf32>, i32 -> vector<4x256xf32>
    %109 = vector.broadcast %5 : vector<1x256xf32> to vector<4x256xf32>
    %110 = arith.mulf %108, %109 : vector<4x256xf32>
    %111 = vector.extract_strided_slice %92 {offsets = [0, 2], sizes = [4, 1], strides = [1, 1]} : vector<4x10xf32> to vector<4x1xf32>
    %112 = vector.broadcast %111 : vector<4x1xf32> to vector<4x256xf32>
    %113 = arith.mulf %110, %112 : vector<4x256xf32>
    %114 = arith.addf %107, %113 : vector<4x256xf32>
    %c1_i32_35 = arith.constant 1 : i32
    %115 = tpu.dynamic_rotate %22 by %c1_i32_35 dim 1 : vector<4x256xf32>, i32 -> vector<4x256xf32>
    %116 = vector.broadcast %7 : vector<1x256xf32> to vector<4x256xf32>
    %117 = arith.mulf %115, %116 : vector<4x256xf32>
    %118 = vector.extract_strided_slice %92 {offsets = [0, 3], sizes = [4, 1], strides = [1, 1]} : vector<4x10xf32> to vector<4x1xf32>
    %119 = vector.broadcast %118 : vector<4x1xf32> to vector<4x256xf32>
    %120 = arith.mulf %117, %119 : vector<4x256xf32>
    %121 = arith.addf %114, %120 : vector<4x256xf32>
    %122 = vector.broadcast %9 : vector<1x256xf32> to vector<4x256xf32>
    %123 = arith.mulf %22, %122 : vector<4x256xf32>
    %124 = vector.extract_strided_slice %92 {offsets = [0, 4], sizes = [4, 1], strides = [1, 1]} : vector<4x10xf32> to vector<4x1xf32>
    %125 = vector.broadcast %124 : vector<4x1xf32> to vector<4x256xf32>
    %126 = arith.mulf %123, %125 : vector<4x256xf32>
    %127 = arith.addf %121, %126 : vector<4x256xf32>
    %c255_i32_36 = arith.constant 255 : i32
    %128 = tpu.dynamic_rotate %22 by %c255_i32_36 dim 1 : vector<4x256xf32>, i32 -> vector<4x256xf32>
    %129 = vector.broadcast %11 : vector<1x256xf32> to vector<4x256xf32>
    %130 = arith.mulf %128, %129 : vector<4x256xf32>
    %131 = vector.extract_strided_slice %92 {offsets = [0, 5], sizes = [4, 1], strides = [1, 1]} : vector<4x10xf32> to vector<4x1xf32>
    %132 = vector.broadcast %131 : vector<4x1xf32> to vector<4x256xf32>
    %133 = arith.mulf %130, %132 : vector<4x256xf32>
    %134 = arith.addf %127, %133 : vector<4x256xf32>
    %c241_i32_37 = arith.constant 241 : i32
    %135 = tpu.dynamic_rotate %22 by %c241_i32_37 dim 1 : vector<4x256xf32>, i32 -> vector<4x256xf32>
    %136 = vector.broadcast %13 : vector<1x256xf32> to vector<4x256xf32>
    %137 = arith.mulf %135, %136 : vector<4x256xf32>
    %138 = vector.extract_strided_slice %92 {offsets = [0, 6], sizes = [4, 1], strides = [1, 1]} : vector<4x10xf32> to vector<4x1xf32>
    %139 = vector.broadcast %138 : vector<4x1xf32> to vector<4x256xf32>
    %140 = arith.mulf %137, %139 : vector<4x256xf32>
    %141 = arith.addf %134, %140 : vector<4x256xf32>
    %c240_i32_38 = arith.constant 240 : i32
    %142 = tpu.dynamic_rotate %22 by %c240_i32_38 dim 1 : vector<4x256xf32>, i32 -> vector<4x256xf32>
    %143 = vector.broadcast %15 : vector<1x256xf32> to vector<4x256xf32>
    %144 = arith.mulf %142, %143 : vector<4x256xf32>
    %145 = vector.extract_strided_slice %92 {offsets = [0, 7], sizes = [4, 1], strides = [1, 1]} : vector<4x10xf32> to vector<4x1xf32>
    %146 = vector.broadcast %145 : vector<4x1xf32> to vector<4x256xf32>
    %147 = arith.mulf %144, %146 : vector<4x256xf32>
    %148 = arith.addf %141, %147 : vector<4x256xf32>
    %c239_i32_39 = arith.constant 239 : i32
    %149 = tpu.dynamic_rotate %22 by %c239_i32_39 dim 1 : vector<4x256xf32>, i32 -> vector<4x256xf32>
    %150 = vector.broadcast %17 : vector<1x256xf32> to vector<4x256xf32>
    %151 = arith.mulf %149, %150 : vector<4x256xf32>
    %152 = vector.extract_strided_slice %92 {offsets = [0, 8], sizes = [4, 1], strides = [1, 1]} : vector<4x10xf32> to vector<4x1xf32>
    %153 = vector.broadcast %152 : vector<4x1xf32> to vector<4x256xf32>
    %154 = arith.mulf %151, %153 : vector<4x256xf32>
    %155 = arith.addf %148, %154 : vector<4x256xf32>
    %156 = vector.extract_strided_slice %92 {offsets = [0, 9], sizes = [4, 1], strides = [1, 1]} : vector<4x10xf32> to vector<4x1xf32>
    %157 = vector.broadcast %156 : vector<4x1xf32> to vector<4x256xf32>
    %158 = arith.addf %155, %157 : vector<4x256xf32>
    %159 = arith.addf %90, %158 : vector<4x256xf32>
    %160 = arith.addf %159, %19 : vector<4x256xf32>
    %c1_40 = arith.constant 1 : index
    %c0_41 = arith.constant 0 : index
    %c0_42 = arith.constant 0 : index
    %161 = vector.load %arg3[%c1_40, %c0_41, %c0_42] : memref<2x4x4xf32, #tpu.memory_space<vmem>>, vector<1x4x4xf32>
    %162 = vector.shape_cast %161 : vector<1x4x4xf32> to vector<4x4xf32>
    %cst_43 = arith.constant dense<0.000000e+00> : vector<4x256xf32>
    %163 = tpu.matmul %162, %160, %cst_43 {dimension_numbers = #tpu.dot_dimension_numbers<[1], [0], [0], [1], [0, 0, 1, 1], [], []>} : vector<4x4xf32>, vector<4x256xf32>, vector<4x256xf32> -> vector<4x256xf32>
    %c2_44 = arith.constant 2 : index
    %c0_45 = arith.constant 0 : index
    %c0_46 = arith.constant 0 : index
    %164 = vector.load %arg2[%c2_44, %c0_45, %c0_46] : memref<4x4x10xf32, #tpu.memory_space<vmem>>, vector<1x4x10xf32>
    %165 = vector.shape_cast %164 : vector<1x4x10xf32> to vector<4x10xf32>
    %cst_47 = arith.constant 0.000000e+00 : f32
    %166 = vector.broadcast %cst_47 : f32 to vector<4x256xf32>
    %c17_i32_48 = arith.constant 17 : i32
    %167 = tpu.dynamic_rotate %160 by %c17_i32_48 dim 1 : vector<4x256xf32>, i32 -> vector<4x256xf32>
    %168 = vector.broadcast %1 : vector<1x256xf32> to vector<4x256xf32>
    %169 = arith.mulf %167, %168 : vector<4x256xf32>
    %170 = vector.extract_strided_slice %165 {offsets = [0, 0], sizes = [4, 1], strides = [1, 1]} : vector<4x10xf32> to vector<4x1xf32>
    %171 = vector.broadcast %170 : vector<4x1xf32> to vector<4x256xf32>
    %172 = arith.mulf %169, %171 : vector<4x256xf32>
    %173 = arith.addf %166, %172 : vector<4x256xf32>
    %c16_i32_49 = arith.constant 16 : i32
    %174 = tpu.dynamic_rotate %160 by %c16_i32_49 dim 1 : vector<4x256xf32>, i32 -> vector<4x256xf32>
    %175 = vector.broadcast %3 : vector<1x256xf32> to vector<4x256xf32>
    %176 = arith.mulf %174, %175 : vector<4x256xf32>
    %177 = vector.extract_strided_slice %165 {offsets = [0, 1], sizes = [4, 1], strides = [1, 1]} : vector<4x10xf32> to vector<4x1xf32>
    %178 = vector.broadcast %177 : vector<4x1xf32> to vector<4x256xf32>
    %179 = arith.mulf %176, %178 : vector<4x256xf32>
    %180 = arith.addf %173, %179 : vector<4x256xf32>
    %c15_i32_50 = arith.constant 15 : i32
    %181 = tpu.dynamic_rotate %160 by %c15_i32_50 dim 1 : vector<4x256xf32>, i32 -> vector<4x256xf32>
    %182 = vector.broadcast %5 : vector<1x256xf32> to vector<4x256xf32>
    %183 = arith.mulf %181, %182 : vector<4x256xf32>
    %184 = vector.extract_strided_slice %165 {offsets = [0, 2], sizes = [4, 1], strides = [1, 1]} : vector<4x10xf32> to vector<4x1xf32>
    %185 = vector.broadcast %184 : vector<4x1xf32> to vector<4x256xf32>
    %186 = arith.mulf %183, %185 : vector<4x256xf32>
    %187 = arith.addf %180, %186 : vector<4x256xf32>
    %c1_i32_51 = arith.constant 1 : i32
    %188 = tpu.dynamic_rotate %160 by %c1_i32_51 dim 1 : vector<4x256xf32>, i32 -> vector<4x256xf32>
    %189 = vector.broadcast %7 : vector<1x256xf32> to vector<4x256xf32>
    %190 = arith.mulf %188, %189 : vector<4x256xf32>
    %191 = vector.extract_strided_slice %165 {offsets = [0, 3], sizes = [4, 1], strides = [1, 1]} : vector<4x10xf32> to vector<4x1xf32>
    %192 = vector.broadcast %191 : vector<4x1xf32> to vector<4x256xf32>
    %193 = arith.mulf %190, %192 : vector<4x256xf32>
    %194 = arith.addf %187, %193 : vector<4x256xf32>
    %195 = vector.broadcast %9 : vector<1x256xf32> to vector<4x256xf32>
    %196 = arith.mulf %160, %195 : vector<4x256xf32>
    %197 = vector.extract_strided_slice %165 {offsets = [0, 4], sizes = [4, 1], strides = [1, 1]} : vector<4x10xf32> to vector<4x1xf32>
    %198 = vector.broadcast %197 : vector<4x1xf32> to vector<4x256xf32>
    %199 = arith.mulf %196, %198 : vector<4x256xf32>
    %200 = arith.addf %194, %199 : vector<4x256xf32>
    %c255_i32_52 = arith.constant 255 : i32
    %201 = tpu.dynamic_rotate %160 by %c255_i32_52 dim 1 : vector<4x256xf32>, i32 -> vector<4x256xf32>
    %202 = vector.broadcast %11 : vector<1x256xf32> to vector<4x256xf32>
    %203 = arith.mulf %201, %202 : vector<4x256xf32>
    %204 = vector.extract_strided_slice %165 {offsets = [0, 5], sizes = [4, 1], strides = [1, 1]} : vector<4x10xf32> to vector<4x1xf32>
    %205 = vector.broadcast %204 : vector<4x1xf32> to vector<4x256xf32>
    %206 = arith.mulf %203, %205 : vector<4x256xf32>
    %207 = arith.addf %200, %206 : vector<4x256xf32>
    %c241_i32_53 = arith.constant 241 : i32
    %208 = tpu.dynamic_rotate %160 by %c241_i32_53 dim 1 : vector<4x256xf32>, i32 -> vector<4x256xf32>
    %209 = vector.broadcast %13 : vector<1x256xf32> to vector<4x256xf32>
    %210 = arith.mulf %208, %209 : vector<4x256xf32>
    %211 = vector.extract_strided_slice %165 {offsets = [0, 6], sizes = [4, 1], strides = [1, 1]} : vector<4x10xf32> to vector<4x1xf32>
    %212 = vector.broadcast %211 : vector<4x1xf32> to vector<4x256xf32>
    %213 = arith.mulf %210, %212 : vector<4x256xf32>
    %214 = arith.addf %207, %213 : vector<4x256xf32>
    %c240_i32_54 = arith.constant 240 : i32
    %215 = tpu.dynamic_rotate %160 by %c240_i32_54 dim 1 : vector<4x256xf32>, i32 -> vector<4x256xf32>
    %216 = vector.broadcast %15 : vector<1x256xf32> to vector<4x256xf32>
    %217 = arith.mulf %215, %216 : vector<4x256xf32>
    %218 = vector.extract_strided_slice %165 {offsets = [0, 7], sizes = [4, 1], strides = [1, 1]} : vector<4x10xf32> to vector<4x1xf32>
    %219 = vector.broadcast %218 : vector<4x1xf32> to vector<4x256xf32>
    %220 = arith.mulf %217, %219 : vector<4x256xf32>
    %221 = arith.addf %214, %220 : vector<4x256xf32>
    %c239_i32_55 = arith.constant 239 : i32
    %222 = tpu.dynamic_rotate %160 by %c239_i32_55 dim 1 : vector<4x256xf32>, i32 -> vector<4x256xf32>
    %223 = vector.broadcast %17 : vector<1x256xf32> to vector<4x256xf32>
    %224 = arith.mulf %222, %223 : vector<4x256xf32>
    %225 = vector.extract_strided_slice %165 {offsets = [0, 8], sizes = [4, 1], strides = [1, 1]} : vector<4x10xf32> to vector<4x1xf32>
    %226 = vector.broadcast %225 : vector<4x1xf32> to vector<4x256xf32>
    %227 = arith.mulf %224, %226 : vector<4x256xf32>
    %228 = arith.addf %221, %227 : vector<4x256xf32>
    %229 = vector.extract_strided_slice %165 {offsets = [0, 9], sizes = [4, 1], strides = [1, 1]} : vector<4x10xf32> to vector<4x1xf32>
    %230 = vector.broadcast %229 : vector<4x1xf32> to vector<4x256xf32>
    %231 = arith.addf %228, %230 : vector<4x256xf32>
    %c3_56 = arith.constant 3 : index
    %c0_57 = arith.constant 0 : index
    %c0_58 = arith.constant 0 : index
    %232 = vector.load %arg2[%c3_56, %c0_57, %c0_58] : memref<4x4x10xf32, #tpu.memory_space<vmem>>, vector<1x4x10xf32>
    %233 = vector.shape_cast %232 : vector<1x4x10xf32> to vector<4x10xf32>
    %cst_59 = arith.constant 0.000000e+00 : f32
    %234 = vector.broadcast %cst_59 : f32 to vector<4x256xf32>
    %c17_i32_60 = arith.constant 17 : i32
    %235 = tpu.dynamic_rotate %163 by %c17_i32_60 dim 1 : vector<4x256xf32>, i32 -> vector<4x256xf32>
    %236 = vector.broadcast %1 : vector<1x256xf32> to vector<4x256xf32>
    %237 = arith.mulf %235, %236 : vector<4x256xf32>
    %238 = vector.extract_strided_slice %233 {offsets = [0, 0], sizes = [4, 1], strides = [1, 1]} : vector<4x10xf32> to vector<4x1xf32>
    %239 = vector.broadcast %238 : vector<4x1xf32> to vector<4x256xf32>
    %240 = arith.mulf %237, %239 : vector<4x256xf32>
    %241 = arith.addf %234, %240 : vector<4x256xf32>
    %c16_i32_61 = arith.constant 16 : i32
    %242 = tpu.dynamic_rotate %163 by %c16_i32_61 dim 1 : vector<4x256xf32>, i32 -> vector<4x256xf32>
    %243 = vector.broadcast %3 : vector<1x256xf32> to vector<4x256xf32>
    %244 = arith.mulf %242, %243 : vector<4x256xf32>
    %245 = vector.extract_strided_slice %233 {offsets = [0, 1], sizes = [4, 1], strides = [1, 1]} : vector<4x10xf32> to vector<4x1xf32>
    %246 = vector.broadcast %245 : vector<4x1xf32> to vector<4x256xf32>
    %247 = arith.mulf %244, %246 : vector<4x256xf32>
    %248 = arith.addf %241, %247 : vector<4x256xf32>
    %c15_i32_62 = arith.constant 15 : i32
    %249 = tpu.dynamic_rotate %163 by %c15_i32_62 dim 1 : vector<4x256xf32>, i32 -> vector<4x256xf32>
    %250 = vector.broadcast %5 : vector<1x256xf32> to vector<4x256xf32>
    %251 = arith.mulf %249, %250 : vector<4x256xf32>
    %252 = vector.extract_strided_slice %233 {offsets = [0, 2], sizes = [4, 1], strides = [1, 1]} : vector<4x10xf32> to vector<4x1xf32>
    %253 = vector.broadcast %252 : vector<4x1xf32> to vector<4x256xf32>
    %254 = arith.mulf %251, %253 : vector<4x256xf32>
    %255 = arith.addf %248, %254 : vector<4x256xf32>
    %c1_i32_63 = arith.constant 1 : i32
    %256 = tpu.dynamic_rotate %163 by %c1_i32_63 dim 1 : vector<4x256xf32>, i32 -> vector<4x256xf32>
    %257 = vector.broadcast %7 : vector<1x256xf32> to vector<4x256xf32>
    %258 = arith.mulf %256, %257 : vector<4x256xf32>
    %259 = vector.extract_strided_slice %233 {offsets = [0, 3], sizes = [4, 1], strides = [1, 1]} : vector<4x10xf32> to vector<4x1xf32>
    %260 = vector.broadcast %259 : vector<4x1xf32> to vector<4x256xf32>
    %261 = arith.mulf %258, %260 : vector<4x256xf32>
    %262 = arith.addf %255, %261 : vector<4x256xf32>
    %263 = vector.broadcast %9 : vector<1x256xf32> to vector<4x256xf32>
    %264 = arith.mulf %163, %263 : vector<4x256xf32>
    %265 = vector.extract_strided_slice %233 {offsets = [0, 4], sizes = [4, 1], strides = [1, 1]} : vector<4x10xf32> to vector<4x1xf32>
    %266 = vector.broadcast %265 : vector<4x1xf32> to vector<4x256xf32>
    %267 = arith.mulf %264, %266 : vector<4x256xf32>
    %268 = arith.addf %262, %267 : vector<4x256xf32>
    %c255_i32_64 = arith.constant 255 : i32
    %269 = tpu.dynamic_rotate %163 by %c255_i32_64 dim 1 : vector<4x256xf32>, i32 -> vector<4x256xf32>
    %270 = vector.broadcast %11 : vector<1x256xf32> to vector<4x256xf32>
    %271 = arith.mulf %269, %270 : vector<4x256xf32>
    %272 = vector.extract_strided_slice %233 {offsets = [0, 5], sizes = [4, 1], strides = [1, 1]} : vector<4x10xf32> to vector<4x1xf32>
    %273 = vector.broadcast %272 : vector<4x1xf32> to vector<4x256xf32>
    %274 = arith.mulf %271, %273 : vector<4x256xf32>
    %275 = arith.addf %268, %274 : vector<4x256xf32>
    %c241_i32_65 = arith.constant 241 : i32
    %276 = tpu.dynamic_rotate %163 by %c241_i32_65 dim 1 : vector<4x256xf32>, i32 -> vector<4x256xf32>
    %277 = vector.broadcast %13 : vector<1x256xf32> to vector<4x256xf32>
    %278 = arith.mulf %276, %277 : vector<4x256xf32>
    %279 = vector.extract_strided_slice %233 {offsets = [0, 6], sizes = [4, 1], strides = [1, 1]} : vector<4x10xf32> to vector<4x1xf32>
    %280 = vector.broadcast %279 : vector<4x1xf32> to vector<4x256xf32>
    %281 = arith.mulf %278, %280 : vector<4x256xf32>
    %282 = arith.addf %275, %281 : vector<4x256xf32>
    %c240_i32_66 = arith.constant 240 : i32
    %283 = tpu.dynamic_rotate %163 by %c240_i32_66 dim 1 : vector<4x256xf32>, i32 -> vector<4x256xf32>
    %284 = vector.broadcast %15 : vector<1x256xf32> to vector<4x256xf32>
    %285 = arith.mulf %283, %284 : vector<4x256xf32>
    %286 = vector.extract_strided_slice %233 {offsets = [0, 7], sizes = [4, 1], strides = [1, 1]} : vector<4x10xf32> to vector<4x1xf32>
    %287 = vector.broadcast %286 : vector<4x1xf32> to vector<4x256xf32>
    %288 = arith.mulf %285, %287 : vector<4x256xf32>
    %289 = arith.addf %282, %288 : vector<4x256xf32>
    %c239_i32_67 = arith.constant 239 : i32
    %290 = tpu.dynamic_rotate %163 by %c239_i32_67 dim 1 : vector<4x256xf32>, i32 -> vector<4x256xf32>
    %291 = vector.broadcast %17 : vector<1x256xf32> to vector<4x256xf32>
    %292 = arith.mulf %290, %291 : vector<4x256xf32>
    %293 = vector.extract_strided_slice %233 {offsets = [0, 8], sizes = [4, 1], strides = [1, 1]} : vector<4x10xf32> to vector<4x1xf32>
    %294 = vector.broadcast %293 : vector<4x1xf32> to vector<4x256xf32>
    %295 = arith.mulf %292, %294 : vector<4x256xf32>
    %296 = arith.addf %289, %295 : vector<4x256xf32>
    %297 = vector.extract_strided_slice %233 {offsets = [0, 9], sizes = [4, 1], strides = [1, 1]} : vector<4x10xf32> to vector<4x1xf32>
    %298 = vector.broadcast %297 : vector<4x1xf32> to vector<4x256xf32>
    %299 = arith.addf %296, %298 : vector<4x256xf32>
    %300 = arith.addf %231, %299 : vector<4x256xf32>
    %301 = arith.addf %300, %160 : vector<4x256xf32>
    %cst_68 = arith.constant 0.000000e+00 : f32
    %302 = vector.broadcast %cst_68 : f32 to vector<4x256xf32>
    %303 = arith.maximumf %301, %302 : vector<4x256xf32>
    %c0_69 = arith.constant 0 : index
    %c0_70 = arith.constant 0 : index
    %c0_71 = arith.constant 0 : index
    %304 = vector.load %arg1[%c0_69, %c0_70, %c0_71] : memref<1x4x256xf32, #tpu.memory_space<vmem>>, vector<1x4x256xf32>
    %305 = vector.shape_cast %304 : vector<1x4x256xf32> to vector<4x256xf32>
    %306 = arith.addf %303, %305 : vector<4x256xf32>
    %c0_72 = arith.constant 0 : index
    %c0_73 = arith.constant 0 : index
    %c0_74 = arith.constant 0 : index
    %307 = vector.load %arg5[%c0_72, %c0_73, %c0_74] : memref<1x4x256xf32, #tpu.memory_space<vmem>>, vector<1x4x256xf32>
    %308 = vector.shape_cast %307 : vector<1x4x256xf32> to vector<4x256xf32>
    %309 = vector.shape_cast %306 : vector<4x256xf32> to vector<1x4x256xf32>
    tpu.vector_store %arg5[%c0_72, %c0_73, %c0_74], %309 {strides = array<i32>} : memref<1x4x256xf32, #tpu.memory_space<vmem>>, vector<1x4x256xf32>,
    return
  }
  func.func @transform_0(%arg0: i32) -> (i32, i32, i32) {
    %c0_i32 = arith.constant 0 : i32
    %c0_i32_0 = arith.constant 0 : i32
    %c0_i32_1 = arith.constant 0 : i32
    return %arg0, %c0_i32, %c0_i32_0 : i32, i32, i32
  }
  func.func @transform_1(%arg0: i32) -> (i32, i32, i32) {
    %c0_i32 = arith.constant 0 : i32
    %c0_i32_0 = arith.constant 0 : i32
    %c0_i32_1 = arith.constant 0 : i32
    %c0_i32_2 = arith.constant 0 : i32
    return %c0_i32, %c0_i32_0, %c0_i32_1 : i32, i32, i32
  }
  func.func @transform_2(%arg0: i32) -> (i32, i32, i32) {
    %c0_i32 = arith.constant 0 : i32
    %c0_i32_0 = arith.constant 0 : i32
    %c0_i32_1 = arith.constant 0 : i32
    %c0_i32_2 = arith.constant 0 : i32
    return %c0_i32, %c0_i32_0, %c0_i32_1 : i32, i32, i32
  }
  func.func @transform_3(%arg0: i32) -> (i32, i32, i32) {
    %c0_i32 = arith.constant 0 : i32
    %c0_i32_0 = arith.constant 0 : i32
    %c0_i32_1 = arith.constant 0 : i32
    %c0_i32_2 = arith.constant 0 : i32
    return %c0_i32, %c0_i32_0, %c0_i32_1 : i32, i32, i32
  }
  func.func @transform_4(%arg0: i32) -> (i32, i32, i32) {
    %c0_i32 = arith.constant 0 : i32
    %c0_i32_0 = arith.constant 0 : i32
    %c0_i32_1 = arith.constant 0 : i32
    return %arg0, %c0_i32, %c0_i32_0 : i32, i32, i32
  }
}

</mosaic_0001>

<bundles_post_ra>
// kernel: tpu_custom_call.1
= control target key start
LH: loop header
LB: loop body
LE: loop exit
PB: predicated region body
PF: predicated region fallthrough
CT: control target
= control target key end

     0   :  { %9 = vsyncpa [#allocation3], 0  ;;  %s2541_s0 = inlined_call_operand.hbm [shape: f32[2,4,256], index: 0, kind: input, shape index: {}]   ;;  %s2542_s1 = inlined_call_operand.hbm [shape: f32[4,4,10], index: 1, kind: input, shape index: {}]   ;;  %s2543_s2 = inlined_call_operand.hbm [shape: f32[2,4,4], index: 2, kind: input, shape index: {}]   ;;  %s2544_s3 = inlined_call_operand.hbm [shape: f32[9,1,256], index: 3, kind: input, shape index: {}]   ;;  %s2545_s4 = inlined_call_operand.hbm [shape: f32[2,4,256], index: 4, kind: output, shape index: {}]  }
   0x1   :  { %11 = vsyncpa [#allocation3 + $0x1], 0 }
   0x2   :  { %12 = vsyncpa [#allocation6], 0 }
   0x3   :  { %13 = vsyncpa [#allocation9], 0 }
   0x4   :  { %14 = vsyncpa [#allocation4], 0 }
   0x5   :  { %16 = vsyncpa [#allocation4 + $0x1], 0  ;;  %s1679_s15 = smov 0   ;;  %s1681_s16 = smov 0  }
   0x6   :  { %s1683_s17 = smov 0   ;;  %s1685_s18 = smov 0  }
   0x7 LB: > { %s1700_s19 = sadd.s32 4294967295, %s1623_s18   ;;  %s1279_s20 = sadd.s32 4294967294, %s1623_s18   ;;  %s1623_s18 = sphi %s1685_s18, %s2583_s18   ;;  %s1619_s17 = sphi %s1683_s17, %s2582_s17   ;;  %s1615_s16 = sphi %s1681_s16, %s2581_s16   ;;  %s1611_s15 = sphi %s1679_s15, %s2580_s15  }
   0x8   : > { %p42_p0 = scmp.ne.s32.totalorder %s1615_s16, %s1611_s15  ;;  %p2546_p1 = scmp.eq.s32.totalorder %s1700_s19, 0 }
   0x9   : > { %p135_p3 = scmp.eq.s32.totalorder %s1279_s20, 1  ;;  %p1280_p5 = scmp.ge.s32.totalorder %s1623_s18, 1 }
   0xa   : > { %p1709_p4 = por %p2546_p1, %p42_p0  ;;  %p142_p7 = scmp.lt.s32.totalorder %s1623_s18, 3 }
   0xb   : > { %p1714_p6 = por %p135_p3, %p42_p0  ;;  %s1625_s24 = smov [#allocation5]  }
   0xc   : > { %s2556_s21 = scalar_select %p1709_p4, 1, 0 }
   0xd   : > { %s2557_s22 = scalar_select %p1714_p6, 1, 0 }
   0xe   : > { %p1719_p8 = pnand %p1280_p5, %p142_p7  ;;  %s154_s25 = sshll.u32 %s1625_s24, 4  ;;  %s155_s25 = int_to_ptr.vmem [resolvable:$true] %s154_s25 }
   0xf   : > { %s1626_s27 = smov [#allocation7]   ;;  %s1627_s29 = smov [#allocation8]  }
  0x10   : > { %s2558_s23 = scalar_select %p1719_p8, 1, 0 }
  0x11   : > { %p1323_p9 = pneg %p1719_p8  ;;  %s167_s28 = sshll.u32 %s1626_s27, 4  ;;  %s168_s28 = int_to_ptr.vmem [resolvable:$true] %s167_s28 }
  0x12   : > { %s180_s30 = sshll.u32 %s1627_s29, 4  ;;  %s1456_s5 = scalar_lea.vmem %s155_s25, 256  ;;  %s181_s30 = int_to_ptr.vmem [resolvable:$true] %s180_s30 }
  0x13   : > { %p1728_p11 = pnand %p1323_p9, %p2546_p1  ;;  %p1457_p13 = scmp.ne.s32.totalorder %s155_s25, %s1456_s5 }
  0x14   : > { %p1464_p5 = scmp.lt.s32.totalorder %s155_s25, %s155_s25  ;;  %p1465_p7 = scmp.lt.s32.totalorder %s1456_s5, %s1456_s5 }
  0x15   : > { %p1447_p12 = pneg %p1728_p11 }
  0x16   : > { %p1466_p9 = por %p1465_p7, %p1464_p5 }
  0x17   : > { %p1459_p0 = pnand %p1457_p13, %p1447_p12 }
  0x19   : > { %p1460_p3 = pneg %p1459_p0 }
  0x1b   : > { %p1467_p10 = pnand %p1466_p9, %p1460_p3 }
  0x1d   : > { %1470 = shalt.err (!%p1467_p10)
}
  0x1e   : > { %s1628_s6 = smov 64   ;;  %s1629_s7 = smov 4  }
  0x1f   : > { %1326 = dma.hbm_to_vmem [thread:$0]  (!%p1728_p11), %s2542_s1, 256, %s155_s25, [#allocation6], %s1628_s6, %s1628_s6, %s1629_s7  }
  0x20   : > { %s1482_s10 = scalar_lea.vmem %s168_s28, 128  ;;  %p1490_p2 = scmp.lt.s32.totalorder %s168_s28, %s168_s28 }
  0x21   : > { %p1483_p1 = scmp.ne.s32.totalorder %s168_s28, %s1482_s10  ;;  %p1491_p6 = scmp.lt.s32.totalorder %s1482_s10, %s1482_s10 }
  0x23   : > { %p1485_p13 = pnand %p1483_p1, %p1447_p12  ;;  %p1492_p5 = por %p1491_p6, %p1490_p2 }
  0x25   : > { %p1486_p0 = pneg %p1485_p13 }
  0x27   : > { %p1493_p3 = pnand %p1492_p5, %p1486_p0 }
  0x29   : > { %1496 = shalt.err (!%p1493_p3)
}
  0x2a   : > { %1329 = dma.hbm_to_vmem [thread:$0]  (!%p1728_p11), %s2543_s2, 128, %s168_s28, [#allocation6], %s1628_s6, %s1628_s6, %s1629_s7  }
  0x2b   : > { %s1508_s13 = scalar_lea.vmem %s181_s30, 288  ;;  %p1516_p9 = scmp.lt.s32.totalorder %s181_s30, %s181_s30 }
  0x2c   : > { %p1509_p10 = scmp.ne.s32.totalorder %s181_s30, %s1508_s13  ;;  %p1517_p13 = scmp.lt.s32.totalorder %s1508_s13, %s1508_s13 }
  0x2e   : > { %p1511_p7 = pnand %p1509_p10, %p1447_p12  ;;  %p1518_p4 = por %p1517_p13, %p1516_p9 }
  0x30   : > { %p1512_p1 = pneg %p1511_p7 }
  0x32   : > { %p1519_p2 = pnand %p1518_p4, %p1512_p1 }
  0x34   : > { %1522 = shalt.err (!%p1519_p2)
}
  0x35   : > { %s1630_s14 = smov 32   ;;  %s1631_s20 = smov 2  }
  0x36   : > { %1332 = dma.hbm_to_vmem [thread:$0]  (!%p1728_p11), %s2544_s3, 288, %s181_s30, [#allocation9], %s1630_s14, %s1630_s14, %s1631_s20  }
  0x37   : > { %s1759_s27 = sadd.s32 1, %s1623_s18   ;;  %s29_s29 = sadd.s32 1, %s1619_s17 }
  0x38   : > { %s26_s28 = ssub.s32 %s1623_s18, %s1759_s27  ;;  %p36_p6 = scmp.ne.s32.totalorder %s1619_s17, %s1615_s16 }
  0x39   : > { %p27_p4 = scmp.eq.s32.totalorder %s26_s28, 0  ;;  %p37_p12 = scmp.eq.s32.totalorder %s1623_s18, 0 }
  0x3a   : > { %p1344_p0 = scmp.lt.s32.totalorder %s1623_s18, 2  ;;  %p2560_p3 = scmp.eq.s32.totalorder %s1700_s19, 1 }
  0x3b   : > { %s1769_s5 = scalar_select %p27_p4, %s1619_s17, %s29_s29  }
  0x3c   : > { %p38_p5 = por %p37_p12, %p36_p6  ;;  %p1773_p10 = por %p2560_p3, %p36_p6 }
  0x3d   : > { %s194_s26 = sand.u32 1, %s1619_s17   ;;  %s1305_s7 = sshll.u32 %s1623_s18, 7 }
  0x3e   : > { %s2561_s6 = scalar_select %p1773_p10, 1, 0 }
  0x3f   : > { %s1285_s30 = sshll.u32 %s194_s26, 3  ;;  %s1782_s10 = scalar_lea.hbm %s2541_s0, %s1305_s7 }
  0x40   : > { %s198_s11 = scalar_lea.vmem [#allocation2], %s1285_s30  ;;  %p1784_p11 = pnand %p1344_p0, %p38_p5 }
  0x41   : > { %s206_s12 = sshll.u32 %s198_s11, 4  ;;  %s195_s14 = scalar_lea.sflag [#allocation3], %s194_s26  ;;  %s207_s12 = int_to_ptr.vmem [resolvable:$true] %s206_s12 }
  0x42   : > { %s1523_s20 = scalar_lea.hbm %s1782_s10, 128  ;;  %p1525_p1 = pneg %p1784_p11 }
  0x43   : > { %p1524_p7 = scmp.ne.s32.totalorder %s1782_s10, %s1523_s20  ;;  %s1528_s28 = scalar_lea.hbm %s2541_s0, 256 }
  0x44   : > { %p1529_p2 = scmp.lt.s32.totalorder %s1782_s10, %s2541_s0  ;;  %p1530_p4 = scmp.lt.s32.totalorder %s1528_s28, %s1523_s20 }
  0x45   : > { %p1526_p9 = pnand %p1525_p1, %p1524_p7 }
  0x46   : > { %p1531_p6 = por %p1530_p4, %p1529_p2 }
  0x47   : > { %p1527_p13 = pneg %p1526_p9 }
  0x49   : > { %p1532_p12 = pnand %p1531_p6, %p1527_p13 }
  0x4b   : > { %1535 = shalt.err (!%p1532_p12)
}
  0x4c   : > { %s1536_s30 = scalar_lea.vmem %s207_s12, 128  ;;  %s1632_s26 = smov [#allocation2]  }
  0x4d   : > { %p1537_p0 = scmp.ne.s32.totalorder %s207_s12, %s1536_s30  ;;  %s1541_s8 = sshll.u32 %s1632_s26, 4  ;;  %s1542_s8 = int_to_ptr.vmem [resolvable:$false] %s1541_s8 }
  0x4e   : > { %s1543_s9 = scalar_lea.vmem %s1542_s8, 256  ;;  %p1544_p7 = scmp.lt.s32.totalorder %s207_s12, %s1542_s8 }
  0x4f   : > { %p1539_p5 = pnand %p1537_p0, %p1525_p1  ;;  %p1545_p9 = scmp.lt.s32.totalorder %s1543_s9, %s1536_s30 }
  0x51   : > { %p1540_p3 = pneg %p1539_p5  ;;  %p1546_p10 = por %p1545_p9, %p1544_p7 }
  0x53   : > { %p1547_p8 = pnand %p1546_p10, %p1540_p3 }
  0x55   : > { %1550 = shalt.err (!%p1547_p8)
}
  0x56   : > { %1336 = dma.hbm_to_vmem [thread:$0]  (!%p1784_p11), %s1782_s10, 128, %s207_s12, %s195_s14  }
  0x57   : > { %p2563_p13 = scmp.ne.s32.totalorder %s2558_s23, 0 }
  0x59   : > { %215 = sbr.rel (%p2563_p13) target bundleno = 873 (0x369), region = 36 }
  0x5e   : > { %s1805_s11 = sand.u32 1, %s1615_s16   ;;  %p2564_p8 = scmp.ne.s32.totalorder %s2556_s21, 0 }
  0x5f   : > { %s1289_s20 = sshll.u32 %s1805_s11, 3  ;;  %s218_s24 = scalar_lea.sflag [#allocation3], %s1805_s11 }
  0x60   : > { %s1811_s25 = scalar_lea.vmem [#allocation2], %s1289_s20 }
  0x61   : > { %1594 = dma.done.wait (%p2564_p8), %s218_s24, 128  }
  0x62   : > { %1596 = vsyncadd (%p2564_p8), %s218_s24, 4294967168  ;;  %p2565_p10 = scmp.eq.s32.totalorder %s1700_s19, 0 }
  0x64   : > { %1598 = dma.done.wait (%p2565_p10), [#allocation6], 384   ;;  %p2566_p11 = pmov %p2565_p10 }
  0x65   : > { %p2567_p1 = pmov %p2565_p10 }
  0x66   : > { %1600 = vsyncadd (%p2566_p11), [#allocation6], 4294966912 }
  0x67   : > { %1602 = dma.done.wait (%p2567_p1), [#allocation9], 288   ;;  %p2568_p2 = pmov %p2567_p1 }
  0x68   : > { %v1633_v0 = vmov 0.0   ;;  %v1634_v1 = vmov 0   ;;  %v1828_v2 = vld [vmem:[%s1811_s25] sm:$0xff]  ;;  %vm283_vm0 = vcmask 1043456   ;;  %v1830_v3 = vld [vmem:[#allocation5 + $0x4] sm:$0xf]  ;;  %v365_v16 = vlaneseq }
  0x69   : > { %1604 = vsyncadd (%p2568_p2), [#allocation9], 4294967008  ;;  %352 = vmatprep.mubr.f32.mxu0 %v1633_v0  ;;  %1410 = vset.pattern.permute.xlu1 %v1634_v1  ;;  %v1834_v4 = vcombine.high %v1828_v2, %v1828_v2  ;;  %v1837_v5 = vld [vmem:[#allocation5] sm:$0xf]  ;;  %v276_v6 = vld [vmem:[#allocation7] sm:$0xf] }
  0x6a   : > { %1408 = vset.pattern.permute.xlu0 %v1634_v1  ;;  %851 = vmatprep.mubr.f32.mxu1 %v1633_v0  ;;  %vm279_vm1 = vcmask 31744   ;;  %v1635_v7 = vmov 1   ;;  %s1636_s21 = smov 17   ;;  %v1637_v8 = vmov 2   ;;  %v1638_v9 = vmov 4   ;;  %s1639_s23 = smov 16  }
  0x6b   : > { %637 = vperm.xlu1 %1410, %v1830_v3   ;;  %385 = vperm.xlu0 %1408, %v1837_v5   ;;  %s1640_s10 = smov 15   ;;  %v1641_v10 = vmov 3   ;;  %s1642_s12 = smov 1   ;;  %v1643_v11 = vmov 5   ;;  %v1645_v12 = vmov 6   ;;  %v1647_v13 = vmov 8  }
  0x6c   : > { %1294 = vmatprep.subr.msk.mxu0 %vm283_vm0, %v1834_v4  ;;  %s1644_s13 = smov 127   ;;  %s1646_s14 = smov 113   ;;  %v1648_v14 = vmov 7   ;;  %v1650_v15 = vmov 9   ;;  %v1905_v19 = vshrl.u32 %v365_v16, 7  ;;  %v1907_v20 = vand.u32 127, %v365_v16 }
  0x6d   : > { %1295 = vmatpush1.msk.msra.mxu0 %vm283_vm0, %v1828_v2  ;;  %s1649_s28 = smov 112   ;;  %v258_v22 = vld [vmem:[#allocation8] sm:$0x3]  ;;  %v260_v29 = vld [vmem:[#allocation8 + $0x2] sm:$0x3]  ;;  %s1651_s29 = smov 111  }
  0x6e   : > { %1296 = vmatmul.mubr.msk.f32.vlgmr.msra.gmra.mxu0 %vm279_vm1, %v276_v6  ;;  %v1912_v23 = vsub.s32 0, %v1905_v19  ;;  %v1915_v24 = vsub.s32 1, %v1905_v19  ;;  %vm367_vm2 = vcmp.lt.s32.totalorder %v1907_v20, 17  ;;  %vm396_vm3 = vcmp.lt.s32.totalorder %v1907_v20, 16  ;;  %v1980_v51 = vld [vmem:[#allocation5 + $0x8] sm:$0xf] }
  0x6f   : > { %1411 = vset.pattern.permute.xlu1 %v1635_v7  ;;  %1409 = vset.pattern.permute.xlu0 %v1635_v7  ;;  %2570 = vst [vmem:[#allocation16_spill] sm:$0xff] %v1980_v51  ;;  %v1994_v52 = vld [vmem:[#allocation5 + $0xc] sm:$0xf]  ;;  %vm424_vm4 = vcmp.lt.s32.totalorder %v1907_v20, 15  ;;  %vm452_vm5 = vcmp.lt.s32.totalorder %v1907_v20, 1  ;;  %vm511_vm6 = vcmp.lt.s32.totalorder %v1907_v20, 127 }
  0x70   : > { %653 = vperm.xlu1 %1411, %v1830_v3   ;;  %413 = vperm.xlu0 %1409, %v1837_v5   ;;  %v1919_v26 = vrot.slane %v258_v22, %v1912_v23  ;;  %v1922_v27 = vrot.slane %v258_v22, %v1915_v24  ;;  %v1932_v35 = vrot.slane %v260_v29, %v1912_v23  ;;  %vm539_vm7 = vcmp.lt.s32.totalorder %v1907_v20, 113  ;;  %s1306_s7 = sshll.u32 %s1700_s19, 7  ;;  %s257_s30 = scalar_lea.vmem [#allocation10], %s1289_s20 }
  0x71   : > { %v1935_v36 = vrot.slane %v260_v29, %v1915_v24  ;;  %2571 = vst [vmem:[#allocation17_spill] sm:$0xff] %v1994_v52  ;;  %vm567_vm8 = vcmp.lt.s32.totalorder %v1907_v20, 112  ;;  %vm595_vm9 = vcmp.lt.s32.totalorder %v1907_v20, 111  ;;  %s1180_s26 = sshll.u32 %s257_s30, 4  ;;  %s1178_s24 = scalar_lea.hbm %s2545_s4, %s1306_s7  ;;  %s1181_s26 = int_to_ptr.vmem [resolvable:$true] %s1180_s26 }
  0x72   : > { %p2577_p6 = scmp.ne.s32.totalorder %s2561_s6, 0  ;;  %s1653_s19 = smov [#allocation10]  }
  0x73   : > { %2569 = vst [vmem:[#allocation15_spill] sm:$0xff] %v1935_v36  ;;  %s1555_s20 = sshll.u32 %s1653_s19, 4  ;;  %s1556_s20 = int_to_ptr.vmem [resolvable:$false] %s1555_s20 }
  0x74   : > { %361 = vrot.lane.b32.xlu1 %v1828_v2, %s1636_s21  ;;  %363 = vrot.lane.b32.xlu0 %v1834_v4, %s1636_s21  ;;  %p1558_p5 = scmp.lt.s32.totalorder %s1181_s26, %s1556_s20 }
  0x75   : > { %1412 = vset.pattern.permute.xlu1 %v1637_v8  ;;  %1413 = vset.pattern.permute.xlu0 %v1638_v9 }
  0x78   : > { %392 = vrot.lane.b32.xlu1 %v1828_v2, %s1639_s23  ;;  %394 = vrot.lane.b32.xlu0 %v1834_v4, %s1639_s23 }
  0x7c   : > { %441 = vperm.xlu1 %1412, %v1837_v5   ;;  %491 = vperm.xlu0 %1413, %v1837_v5  }
  0x80   : > { %420 = vrot.lane.b32.xlu1 %v1828_v2, %s1640_s10  ;;  %1414 = vset.pattern.permute.xlu0 %v1637_v8 }
  0x81   : > { %1416 = vset.pattern.permute.xlu1 %v1638_v9  ;;  %669 = vperm.xlu0 %1414, %v1830_v3  }
  0x84   : > { %422 = vrot.lane.b32.xlu1 %v1834_v4, %s1640_s10 }
  0x85   : > { %1415 = vset.pattern.permute.xlu0 %v1641_v10 }
  0x86   : > { %469 = vperm.xlu0 %1415, %v1837_v5  }
  0x88   : > { %448 = vrot.lane.b32.xlu1 %v1828_v2, %s1642_s12 }
  0x8a   : > { %685 = vperm.xlu0 %1415, %v1830_v3  }
  0x8c   : > { %695 = vperm.xlu1 %1416, %v1830_v3  }
  0x8e   : > { %450 = vrot.lane.b32.xlu0 %v1834_v4, %s1642_s12 }
  0x8f   : > { %1417 = vset.pattern.permute.xlu0 %v1643_v11 }
  0x90   : > { %1418 = vset.pattern.permute.xlu1 %v1643_v11 }
  0x91   : > { %711 = vperm.xlu1 %1418, %v1830_v3  }
  0x92   : > { %528 = vperm.xlu0 %1417, %v1837_v5  }
  0x95   : > { %507 = vrot.lane.b32.xlu1 %v1828_v2, %s1644_s13 }
  0x96   : > { %1419 = vset.pattern.permute.xlu1 %v1645_v12  ;;  %509 = vrot.lane.b32.xlu0 %v1834_v4, %s1644_s13 }
  0x97   : > { %1420 = vset.pattern.permute.xlu0 %v1645_v12 }
  0x99   : > { %556 = vperm.xlu1 %1419, %v1837_v5  }
  0x9a   : > { %727 = vperm.xlu0 %1420, %v1830_v3  }
  0x9d   : > { %535 = vrot.lane.b32.xlu1 %v1828_v2, %s1646_s14 }
  0x9e   : > { %1422 = vset.pattern.permute.xlu1 %v1647_v13  ;;  %1421 = vset.pattern.permute.xlu0 %v1648_v14 }
  0x9f   : > { %584 = vperm.xlu0 %1421, %v1837_v5  }
  0xa1   : > { %537 = vrot.lane.b32.xlu1 %v1834_v4, %s1646_s14 }
  0xa3   : > { %743 = vperm.xlu0 %1421, %v1830_v3  }
  0xa5   : > { %563 = vrot.lane.b32.xlu1 %v1828_v2, %s1649_s28 }
  0xa7   : > { %565 = vrot.lane.b32.xlu0 %v1834_v4, %s1649_s28 }
  0xa8   : > { %1423 = vset.pattern.permute.xlu0 %v1647_v13 }
  0xa9   : > { %612 = vperm.xlu1 %1422, %v1837_v5  }
  0xad   : > { %1425 = vset.pattern.permute.xlu1 %v1650_v15 }
  0xe6   : > { %v1903_v17 = vpop.permute.xlu1 %637  ;;  %v386_v18 = vpop.permute.xlu0 %385 }
  0xeb   : > { %v1909_v21 = vpop.permute.xlu1 %653  ;;  %v414_v25 = vpop.permute.xlu0 %413 }
  0xef   : > { %v362_v28 = vpop.permute.xlu1 %361  ;;  %v364_v30 = vpop.permute.xlu0 %363 }
  0xf0   : > { %v368_v31 = vsel %vm367_vm2, %v362_v28, %v364_v30  ;;  %v369_v32 = vsel %vm367_vm2, %v364_v30, %v362_v28 }
  0xf1   : > { %v381_v33 = vmul.f32 %v1919_v26, %v369_v32  ;;  %v382_v34 = vmul.f32 %v1922_v27, %v368_v31 }
  0xf3   : > { %v393_v37 = vpop.permute.xlu1 %392  ;;  %v395_v38 = vpop.permute.xlu0 %394  ;;  %v388_v41 = vmul.f32 %v386_v18, %v381_v33  ;;  %v389_v42 = vmul.f32 %v386_v18, %v382_v34  ;;  %v262_v18 = vld [vmem:[#allocation8 + $0x4] sm:$0x3] }
  0xf4   : > { %v397_v39 = vsel %vm396_vm3, %v393_v37, %v395_v38  ;;  %v398_v40 = vsel %vm396_vm3, %v395_v38, %v393_v37  ;;  %v2074_v29 = vrot.slane %v262_v18, %v1912_v23  ;;  %v2077_v30 = vrot.slane %v262_v18, %v1915_v24  ;;  %v264_v37 = vld [vmem:[#allocation8 + $0x6] sm:$0x3] }
  0xf5   : > { %v410_v43 = vmul.f32 %v1932_v35, %v398_v40  ;;  %v411_v44 = vmul.f32 %v1935_v36, %v397_v39 }
  0xf6   : > { %2572 = vst [vmem:[#allocation18_spill] sm:$0xff] %v2077_v30 }
  0xf7   : > { %v416_v45 = vmul.f32 %v414_v25, %v410_v43  ;;  %v417_v46 = vmul.f32 %v414_v25, %v411_v44  ;;  %v1999_v53 = vpop.permute.xlu1 %441  ;;  %v2019_v57 = vpop.permute.xlu0 %491  ;;  %v266_v25 = vld [vmem:[#allocation8 + $0x8] sm:$0x3]  ;;  %v2100_v44 = vrot.slane %v264_v37, %v1912_v23 }
  0xf8   : > { %v2084_v33 = vrot.slane %v266_v25, %v1912_v23  ;;  %v2087_v34 = vrot.slane %v266_v25, %v1915_v24 }
  0xf9   : > { %v1943_v47 = vadd.f32 %v416_v45, %v388_v41  ;;  %v1945_v48 = vadd.f32 %v417_v46, %v389_v42  ;;  %v2103_v45 = vrot.slane %v264_v37, %v1915_v24 }
  0xfa   : > { %v487_v41 = vcombine.low %v2084_v33, %v2087_v34 }
  0xfb   : > { %v421_v54 = vpop.permute.xlu1 %420 }
  0xfc   : > { %v2028_v59 = vpop.permute.xlu0 %669 }
  0xff   : > { %v423_v55 = vpop.permute.xlu1 %422 }
 0x100   : > { %v425_v31 = vsel %vm424_vm4, %v421_v54, %v423_v55  ;;  %v426_v32 = vsel %vm424_vm4, %v423_v55, %v421_v54 }
 0x101   : > { %v2035_v61 = vpop.permute.xlu0 %469  ;;  %v438_v42 = vmul.f32 %v2074_v29, %v426_v32  ;;  %v439_v43 = vmul.f32 %v2077_v30, %v425_v31  ;;  %v268_v32 = vld [vmem:[#allocation8 + $0xa] sm:$0x3] }
 0x103   : > { %v2015_v56 = vpop.permute.xlu1 %448  ;;  %v444_v18 = vmul.f32 %v1999_v53, %v438_v42  ;;  %v445_v25 = vmul.f32 %v1999_v53, %v439_v43 }
 0x105   : > { %v2041_v63 = vpop.permute.xlu0 %685 }
 0x107   : > { %v2022_v58 = vpop.permute.xlu1 %695 }
 0x10c   : > { %v2030_v60 = vpop.permute.xlu1 %711 }
 0x110   : > { %v2037_v62 = vpop.permute.xlu1 %507 }
 0x114   : > { %v2043_v0 = vpop.permute.xlu1 %556 }
 0x12e   : > { %v1947_v49 = vpop.f32.mrf.mxu0 }
 0x12f   : > { %644 = vrot.lane.b32.xlu0 %v1947_v49, %s1639_s23  ;;  %627 = vrot.lane.b32.xlu1 %v1947_v49, %s1636_s21 }
 0x130   : > { %v1961_v50 = vpop.f32.mrf.mxu0 }
 0x133   : > { %702 = vrot.lane.b32.xlu0 %v1947_v49, %s1644_s13  ;;  %660 = vrot.lane.b32.xlu1 %v1947_v49, %s1640_s10 }
 0x137   : > { %734 = vrot.lane.b32.xlu0 %v1947_v49, %s1649_s28  ;;  %676 = vrot.lane.b32.xlu1 %v1947_v49, %s1642_s12 }
 0x13b   : > { %718 = vrot.lane.b32.xlu1 %v1947_v49, %s1646_s14  ;;  %678 = vrot.lane.b32.xlu0 %v1961_v50, %s1642_s12 }
 0x13f   : > { %759 = vperm.xlu0 %1423, %v1830_v3   ;;  %629 = vrot.lane.b32.xlu1 %v1961_v50, %s1636_s21 }
 0x143   : > { %750 = vrot.lane.b32.xlu0 %v1947_v49, %s1651_s29  ;;  %646 = vrot.lane.b32.xlu1 %v1961_v50, %s1639_s23 }
 0x144   : > { %1424 = vset.pattern.permute.xlu0 %v1650_v15 }
 0x147   : > { %662 = vrot.lane.b32.xlu1 %v1961_v50, %s1640_s10  ;;  %620 = vperm.xlu0 %1424, %v1837_v5  }
 0x14b   : > { %591 = vrot.lane.b32.xlu1 %v1828_v2, %s1651_s29  ;;  %1427 = vset.pattern.permute.xlu0 %v1635_v7 }
 0x14c   : > { %886 = vperm.xlu0 %1427, %v1980_v51  }
 0x14f   : > { %593 = vrot.lane.b32.xlu1 %v1834_v4, %s1651_s29 }
 0x150   : > { %1430 = vset.pattern.permute.xlu0 %v1645_v12 }
 0x151   : > { %960 = vperm.xlu0 %1430, %v1980_v51  }
 0x153   : > { %704 = vrot.lane.b32.xlu1 %v1961_v50, %s1644_s13 }
 0x155   : > { %1431 = vset.pattern.permute.xlu0 %v1637_v8 }
 0x156   : > { %902 = vperm.xlu0 %1431, %v1980_v51  }
 0x157   : > { %720 = vrot.lane.b32.xlu1 %v1961_v50, %s1646_s14 }
 0x15a   : > { %1049 = vperm.xlu0 %1431, %v1994_v52  }
 0x15b   : > { %736 = vrot.lane.b32.xlu1 %v1961_v50, %s1649_s28 }
 0x15e   : > { %1434 = vset.pattern.permute.xlu0 %v1641_v10 }
 0x15f   : > { %752 = vrot.lane.b32.xlu1 %v1961_v50, %s1651_s29  ;;  %918 = vperm.xlu0 %1434, %v1980_v51  }
 0x163   : > { %767 = vperm.xlu1 %1425, %v1830_v3   ;;  %1065 = vperm.xlu0 %1434, %v1994_v52   ;;  %v2048_v3 = vpop.permute.xlu1 %535 }
 0x167   : > { %1426 = vset.pattern.permute.xlu1 %v1634_v1  ;;  %1435 = vset.pattern.permute.xlu0 %v1638_v9  ;;  %v2054_v6 = vpop.permute.xlu1 %537 }
 0x168   : > { %870 = vperm.xlu1 %1426, %v1980_v51   ;;  %1075 = vperm.xlu0 %1435, %v1994_v52  }
 0x16b   : > { %v2056_v8 = vpop.permute.xlu1 %563 }
 0x16c   : > { %1428 = vset.pattern.permute.xlu1 %v1638_v9  ;;  %1438 = vset.pattern.permute.xlu0 %v1648_v14  ;;  %v1652_v14 = vmov 839922192  }
 0x16d   : > { %928 = vperm.xlu1 %1428, %v1980_v51   ;;  %976 = vperm.xlu0 %1438, %v1980_v51   ;;  %v494_v16 = vunpack.c.l.s4 %v1652_v14  ;;  %v489_v14 = vmul.f32 %v487_v41, %v1828_v2  ;;  %v270_v41 = vld [vmem:[#allocation8 + $0xc] sm:$0x3] }
 0x16f   : > { %v2058_v9 = vpop.permute.xlu1 %612  ;;  %v495_v28 = vunpack.c.0.s8 %v494_v16 }
 0x171   : > { %1429 = vset.pattern.permute.xlu1 %v1643_v11  ;;  %1123 = vperm.xlu0 %1438, %v1994_v52   ;;  %v498_v40 = vsub.s32 %v495_v28, %v1905_v19 }
 0x172   : > { %944 = vperm.xlu1 %1429, %v1980_v51  }
 0x173   : > { %v499_v16 = vrot.slane %v2019_v57, %v498_v40  ;;  %v447_v57 = vadd.f32 %v445_v25, %v1945_v48  ;;  %v2138_v48 = vrot.slane %v270_v41, %v1912_v23  ;;  %v540_v25 = vsel %vm539_vm7, %v2048_v3, %v2054_v6 }
 0x175   : > { %1440 = vset.pattern.permute.xlu0 %v1647_v13 }
 0x176   : > { %1432 = vset.pattern.permute.xlu1 %v1634_v1  ;;  %1139 = vperm.xlu0 %1440, %v1994_v52   ;;  %v451_v1 = vpop.permute.xlu0 %450 }
 0x177   : > { %1017 = vperm.xlu1 %1432, %v1994_v52   ;;  %v453_v46 = vsel %vm452_vm5, %v2015_v56, %v451_v1  ;;  %v454_v19 = vsel %vm452_vm5, %v451_v1, %v2015_v56  ;;  %v2119_v56 = vrot.slane %v268_v32, %v1912_v23  ;;  %v446_v1 = vadd.f32 %v444_v18, %v1943_v47 }
 0x178   : > { %v466_v28 = vmul.f32 %v2100_v44, %v454_v19  ;;  %v467_v31 = vmul.f32 %v2103_v45, %v453_v46  ;;  %v2131_v19 = vrot.slane %v268_v32, %v1915_v24  ;;  %v2149_v32 = vrot.slane %v270_v41, %v1915_v24 }
 0x179   : > { %v553_v41 = vmul.f32 %v2138_v48, %v540_v25 }
 0x17a   : > { %1441 = vset.pattern.permute.xlu0 %v1650_v15  ;;  %v2052_v5 = vpop.permute.xlu0 %528  ;;  %v472_v40 = vmul.f32 %v2035_v61, %v466_v28  ;;  %v473_v53 = vmul.f32 %v2035_v61, %v467_v31 }
 0x17b   : > { %1433 = vset.pattern.permute.xlu1 %v1635_v7 }
 0x17c   : > { %1033 = vperm.xlu1 %1433, %v1994_v52  }
 0x17e   : > { %v510_v7 = vpop.permute.xlu0 %509 }
 0x17f   : > { %v512_v43 = vsel %vm511_vm6, %v2037_v62, %v510_v7  ;;  %v513_v47 = vsel %vm511_vm6, %v510_v7, %v2037_v62  ;;  %v541_v7 = vsel %vm539_vm7, %v2054_v6, %v2048_v3 }
 0x180   : > { %1436 = vset.pattern.permute.xlu1 %v1643_v11  ;;  %v525_v18 = vmul.f32 %v2119_v56, %v512_v43  ;;  %v526_v31 = vmul.f32 %v2131_v19, %v513_v47 }
 0x181   : > { %1091 = vperm.xlu1 %1436, %v1994_v52  }
 0x182   : > { %v2060_v10 = vpop.permute.xlu0 %727  ;;  %v531_v43 = vmul.f32 %v2052_v5, %v525_v18 }
 0x185   : > { %1437 = vset.pattern.permute.xlu1 %v1645_v12 }
 0x186   : > { %1107 = vperm.xlu1 %1437, %v1994_v52   ;;  %v2064_v12 = vpop.permute.xlu0 %584  ;;  %v501_v52 = vmul.f32 %v499_v16, %v489_v14  ;;  %v474_v14 = vadd.f32 %v472_v40, %v446_v1  ;;  %v475_v16 = vadd.f32 %v473_v53, %v447_v57 }
 0x188   : > { %v503_v61 = vcombine.high %v501_v52, %v501_v52  ;;  %v505_v40 = vadd.f32 %v501_v52, %v474_v14  ;;  %v272_v14 = vld [vmem:[#allocation8 + $0xe] sm:$0x3] }
 0x18a   : > { %1439 = vset.pattern.permute.xlu1 %v1647_v13  ;;  %v506_v53 = vadd.f32 %v503_v61, %v475_v16  ;;  %v554_v61 = vmul.f32 %v2149_v32, %v541_v7  ;;  %v2189_v7 = vrot.slane %v272_v14, %v1915_v24 }
 0x18b   : > { %992 = vperm.xlu1 %1439, %v1980_v51  }
 0x18f   : > { %1442 = vset.pattern.permute.xlu1 %v1650_v15  ;;  %v2068_v15 = vpop.permute.xlu0 %743 }
 0x193   : > { %v2092_v39 = vpop.permute.xlu0 %565 }
 0x1a1   : > { %v2062_v11 = vpop.permute.xlu1 %627  ;;  %v645_v55 = vpop.permute.xlu0 %644 }
 0x1a5   : > { %v2066_v13 = vpop.permute.xlu1 %660  ;;  %v2125_v42 = vpop.permute.xlu0 %702 }
 0x1a9   : > { %v2070_v22 = vpop.permute.xlu1 %676  ;;  %v2151_v62 = vpop.permute.xlu0 %734 }
 0x1ad   : > { %v2089_v38 = vpop.permute.xlu1 %718 }
 0x1b1   : > { %v630_v54 = vpop.permute.xlu1 %629 }
 0x1b2   : > { %v631_v47 = vsel %vm367_vm2, %v2062_v11, %v630_v54  ;;  %v632_v3 = vsel %vm367_vm2, %v630_v54, %v2062_v11  ;;  %v679_v11 = vpop.permute.xlu0 %678 }
 0x1b3   : > { %v633_v54 = vmul.f32 %v632_v3, %v1919_v26  ;;  %v634_v25 = vmul.f32 %v631_v47, %v1922_v27 }
 0x1b5   : > { %v647_v37 = vpop.permute.xlu1 %646 }
 0x1b6   : > { %v648_v1 = vsel %vm396_vm3, %v645_v55, %v647_v37  ;;  %v649_v57 = vsel %vm396_vm3, %v647_v37, %v645_v55  ;;  %v532_v37 = vmul.f32 %v2052_v5, %v526_v31  ;;  %v559_v5 = vmul.f32 %v2043_v0, %v553_v41 }
 0x1b7   : > { %v650_v16 = vmul.f32 %v649_v57, %v1932_v35  ;;  %v651_v18 = vmul.f32 %v648_v1, %v1935_v36  ;;  %v2186_v31 = vrot.slane %v272_v14, %v1912_v23  ;;  %v560_v36 = vmul.f32 %v2043_v0, %v554_v61 }
 0x1b8   : > { %v534_v57 = vadd.f32 %v532_v37, %v506_v53  ;;  %v680_v53 = vsel %vm452_vm5, %v2070_v22, %v679_v11  ;;  %v681_v0 = vsel %vm452_vm5, %v679_v11, %v2070_v22  ;;  %v641_v41 = vmul.f32 %v1903_v17, %v634_v25 }
 0x1b9   : > { %v663_v46 = vpop.permute.xlu1 %662  ;;  %v656_v3 = vmul.f32 %v1909_v21, %v650_v16  ;;  %v657_v47 = vmul.f32 %v1909_v21, %v651_v18  ;;  %v640_v21 = vmul.f32 %v1903_v17, %v633_v54  ;;  %v274_v18 = vld [vmem:[#allocation8 + $0x10] sm:$0x3] }
 0x1ba   : > { %v664_v6 = vsel %vm424_vm4, %v2066_v13, %v663_v46  ;;  %v665_v52 = vsel %vm424_vm4, %v663_v46, %v2066_v13  ;;  %v533_v46 = vadd.f32 %v531_v43, %v505_v40  ;;  %v568_v40 = vsel %vm567_vm8, %v2056_v8, %v2092_v39  ;;  %v760_v54 = vpop.permute.xlu0 %759 }
 0x1bb   : > { %v666_v51 = vmul.f32 %v665_v52, %v2074_v29  ;;  %v667_v13 = vmul.f32 %v664_v6, %v2077_v30  ;;  %v569_v43 = vsel %vm567_vm8, %v2092_v39, %v2056_v8  ;;  %v682_v8 = vmul.f32 %v681_v0, %v2100_v44 }
 0x1bc   : > { %v561_v37 = vadd.f32 %v559_v5, %v533_v46  ;;  %v683_v39 = vmul.f32 %v680_v53, %v2103_v45  ;;  %v658_v14 = vadd.f32 %v656_v3, %v640_v21  ;;  %v659_v16 = vadd.f32 %v657_v47, %v641_v41 }
 0x1bd   : > { %v2145_v28 = vpop.permute.xlu1 %591  ;;  %v672_v6 = vmul.f32 %v2028_v59, %v666_v51  ;;  %v673_v52 = vmul.f32 %v2028_v59, %v667_v13  ;;  %v562_v30 = vadd.f32 %v560_v36, %v534_v57  ;;  %v581_v22 = vmul.f32 %v2186_v31, %v568_v40 }
 0x1be   : > { %v582_v11 = vmul.f32 %v2189_v7, %v569_v43  ;;  %v692_v36 = vmul.f32 %v2084_v33, %v1947_v49  ;;  %v2226_v13 = vrot.slane %v274_v18, %v1912_v23  ;;  %v2229_v46 = vrot.slane %v274_v18, %v1915_v24  ;;  %v751_v0 = vpop.permute.xlu0 %750 }
 0x1bf   : > { %v674_v17 = vadd.f32 %v672_v6, %v658_v14  ;;  %v675_v51 = vadd.f32 %v673_v52, %v659_v16  ;;  %v693_v5 = vmul.f32 %v2087_v34, %v1961_v50  ;;  %v688_v3 = vmul.f32 %v2041_v63, %v682_v8 }
 0x1c0   : > { %v689_v47 = vmul.f32 %v2041_v63, %v683_v39  ;;  %v698_v53 = vmul.f32 %v2022_v58, %v692_v36  ;;  %v587_v16 = vmul.f32 %v2064_v12, %v581_v22  ;;  %v588_v18 = vmul.f32 %v2064_v12, %v582_v11 }
 0x1c1   : > { %v594_v55 = vpop.permute.xlu1 %593  ;;  %v699_v21 = vmul.f32 %v2022_v58, %v693_v5 }
 0x1c2   : > { %v596_v24 = vsel %vm595_vm9, %v2145_v28, %v594_v55  ;;  %v597_v49 = vsel %vm595_vm9, %v594_v55, %v2145_v28  ;;  %v691_v40 = vadd.f32 %v689_v47, %v675_v51  ;;  %v589_v11 = vadd.f32 %v587_v16, %v561_v37 }
 0x1c3   : > { %v609_v6 = vmul.f32 %v2226_v13, %v596_v24  ;;  %v610_v52 = vmul.f32 %v2229_v46, %v597_v49 }
 0x1c4   : > { %v701_v51 = vadd.f32 %v699_v21, %v691_v40 }
 0x1c5   : > { %v705_v1 = vpop.permute.xlu1 %704 }
 0x1c6   : > { %v706_v59 = vsel %vm511_vm6, %v2125_v42, %v705_v1  ;;  %v707_v25 = vsel %vm511_vm6, %v705_v1, %v2125_v42  ;;  %v690_v1 = vadd.f32 %v688_v3, %v674_v17 }
 0x1c7   : > { %v708_v50 = vmul.f32 %v706_v59, %v2119_v56  ;;  %v709_v63 = vmul.f32 %v707_v25, %v2131_v19 }
 0x1c8   : > { %v700_v17 = vadd.f32 %v698_v53, %v690_v1 }
 0x1c9   : > { %v721_v61 = vpop.permute.xlu1 %720  ;;  %v714_v8 = vmul.f32 %v2030_v60, %v708_v50  ;;  %v715_v39 = vmul.f32 %v2030_v60, %v709_v63  ;;  %v615_v60 = vmul.f32 %v2058_v9, %v609_v6 }
 0x1ca   : > { %v722_v42 = vsel %vm539_vm7, %v2089_v38, %v721_v61  ;;  %v723_v23 = vsel %vm539_vm7, %v721_v61, %v2089_v38 }
 0x1cb   : > { %v724_v28 = vmul.f32 %v722_v42, %v2138_v48  ;;  %v725_v55 = vmul.f32 %v723_v23, %v2149_v32  ;;  %v716_v3 = vadd.f32 %v714_v8, %v700_v17  ;;  %v717_v47 = vadd.f32 %v715_v39, %v701_v51 }
 0x1cc   : > { %v590_v42 = vadd.f32 %v588_v18, %v562_v30  ;;  %v617_v50 = vadd.f32 %v615_v60, %v589_v11 }
 0x1cd   : > { %v737_v57 = vpop.permute.xlu1 %736  ;;  %v730_v59 = vmul.f32 %v2060_v10, %v724_v28  ;;  %v731_v25 = vmul.f32 %v2060_v10, %v725_v55 }
 0x1ce   : > { %v738_v43 = vsel %vm567_vm8, %v2151_v62, %v737_v57  ;;  %v739_v38 = vsel %vm567_vm8, %v737_v57, %v2151_v62  ;;  %v616_v57 = vmul.f32 %v2058_v9, %v610_v52 }
 0x1cf   : > { %v740_v58 = vmul.f32 %v738_v43, %v2186_v31  ;;  %v741_v14 = vmul.f32 %v739_v38, %v2189_v7  ;;  %v732_v23 = vadd.f32 %v730_v59, %v716_v3  ;;  %v733_v24 = vadd.f32 %v731_v25, %v717_v47  ;;  %v621_v43 = vpop.permute.xlu0 %620 }
 0x1d0   : > { %v618_v63 = vadd.f32 %v616_v57, %v590_v42 }
 0x1d1   : > { %v753_v41 = vpop.permute.xlu1 %752  ;;  %v746_v22 = vmul.f32 %v2068_v15, %v740_v58  ;;  %v747_v12 = vmul.f32 %v2068_v15, %v741_v14 }
 0x1d2   : > { %v754_v61 = vsel %vm595_vm9, %v751_v0, %v753_v41  ;;  %v755_v62 = vsel %vm595_vm9, %v753_v41, %v751_v0  ;;  %v623_v0 = vadd.f32 %v621_v43, %v617_v50  ;;  %v624_v21 = vadd.f32 %v621_v43, %v618_v63  ;;  %v2573_v50 = vld [vmem:[#allocation15_spill] sm:$0xff] }
 0x1d3   : > { %v756_v36 = vmul.f32 %v754_v61, %v2226_v13  ;;  %v757_v5 = vmul.f32 %v755_v62, %v2229_v46  ;;  %v748_v1 = vadd.f32 %v746_v22, %v732_v23  ;;  %v749_v40 = vadd.f32 %v747_v12, %v733_v24 }
 0x1d5   : > { %v762_v49 = vmul.f32 %v760_v54, %v756_v36  ;;  %v763_v10 = vmul.f32 %v760_v54, %v757_v5  ;;  %v777_v54 = vld [vmem:[#allocation7 + $0x4] sm:$0xf] }
 0x1d7   : > { %v764_v38 = vadd.f32 %v762_v49, %v748_v1  ;;  %v765_v53 = vadd.f32 %v763_v10, %v749_v40 }
 0x1de   : > { %v768_v9 = vpop.permute.xlu1 %767 }
 0x1df   : > { %v770_v28 = vadd.f32 %v768_v9, %v764_v38  ;;  %v771_v55 = vadd.f32 %v768_v9, %v765_v53 }
 0x1e1   : > { %v772_v41 = vadd.f32 %v770_v28, %v623_v0  ;;  %v773_v15 = vadd.f32 %v771_v55, %v624_v21 }
 0x1e3   : > { %v2280_v30 = vadd.f32 %v772_v41, %v1828_v2  ;;  %v2283_v37 = vadd.f32 %v773_v15, %v1834_v4  ;;  %v887_v2 = vpop.permute.xlu0 %886  ;;  %v871_v61 = vpop.permute.xlu1 %870  ;;  %v2574_v15 = vld [vmem:[#allocation18_spill] sm:$0xff] }
 0x1e5   : > { %862 = vrot.lane.b32.xlu0 %v2283_v37, %s1636_s21  ;;  %1297 = vmatprep.subr.msk.mxu1 %vm283_vm0, %v2283_v37 }
 0x1e6   : > { %860 = vrot.lane.b32.xlu1 %v2280_v30, %s1636_s21  ;;  %1298 = vmatpush1.msk.msra.mxu1 %vm283_vm0, %v2280_v30 }
 0x1e7   : > { %1299 = vmatmul.mubr.msk.f32.vlgmr.msra.gmra.mxu1 %vm279_vm1, %v777_v54  ;;  %v2322_v6 = vpop.permute.xlu0 %960 }
 0x1e8   : > { %v929_v8 = vpop.permute.xlu1 %928 }
 0x1e9   : > { %877 = vrot.lane.b32.xlu0 %v2280_v30, %s1639_s23 }
 0x1ea   : > { %879 = vrot.lane.b32.xlu1 %v2283_v37, %s1639_s23 }
 0x1eb   : > { %v903_v52 = vpop.permute.xlu0 %902 }
 0x1ed   : > { %937 = vrot.lane.b32.xlu0 %v2283_v37, %s1644_s13  ;;  %v2326_v58 = vpop.permute.xlu1 %944 }
 0x1ee   : > { %893 = vrot.lane.b32.xlu1 %v2280_v30, %s1640_s10 }
 0x1ef   : > { %v2324_v62 = vpop.permute.xlu0 %1049 }
 0x1f1   : > { %951 = vrot.lane.b32.xlu0 %v2280_v30, %s1646_s14 }
 0x1f2   : > { %895 = vrot.lane.b32.xlu1 %v2283_v37, %s1640_s10  ;;  %v2330_v16 = vpop.permute.xlu1 %1017 }
 0x1f3   : > { %v919_v39 = vpop.permute.xlu0 %918 }
 0x1f5   : > { %969 = vrot.lane.b32.xlu0 %v2283_v37, %s1649_s28 }
 0x1f6   : > { %909 = vrot.lane.b32.xlu1 %v2280_v30, %s1642_s12 }
 0x1f7   : > { %v2328_v14 = vpop.permute.xlu0 %1065  ;;  %v2334_v17 = vpop.permute.xlu1 %1033 }
 0x1fa   : > { %911 = vrot.lane.b32.xlu1 %v2283_v37, %s1642_s12 }
 0x1fb   : > { %v2332_v18 = vpop.permute.xlu0 %1075 }
 0x1fc   : > { %v2338_v59 = vpop.permute.xlu1 %1091 }
 0x1fe   : > { %935 = vrot.lane.b32.xlu1 %v2280_v30, %s1644_s13 }
 0x1ff   : > { %v2336_v51 = vpop.permute.xlu0 %976 }
 0x201   : > { %v2342_v36 = vpop.permute.xlu1 %1107 }
 0x202   : > { %953 = vrot.lane.b32.xlu1 %v2283_v37, %s1646_s14 }
 0x203   : > { %v2340_v25 = vpop.permute.xlu0 %1123 }
 0x206   : > { %967 = vrot.lane.b32.xlu1 %v2280_v30, %s1649_s28  ;;  %v2346_v60 = vpop.permute.xlu1 %992 }
 0x207   : > { %v2344_v5 = vpop.permute.xlu0 %1139 }
 0x20a   : > { %983 = vrot.lane.b32.xlu1 %v2280_v30, %s1651_s29 }
 0x20e   : > { %985 = vrot.lane.b32.xlu1 %v2283_v37, %s1651_s29 }
 0x257   : > { %v863_v57 = vpop.permute.xlu0 %862 }
 0x258   : > { %v861_v3 = vpop.permute.xlu1 %860 }
 0x259   : > { %v864_v47 = vsel %vm367_vm2, %v861_v3, %v863_v57  ;;  %v865_v22 = vsel %vm367_vm2, %v863_v57, %v861_v3 }
 0x25a   : > { %v866_v11 = vmul.f32 %v865_v22, %v1919_v26  ;;  %v867_v42 = vmul.f32 %v864_v47, %v1922_v27 }
 0x25b   : > { %v878_v12 = vpop.permute.xlu0 %877 }
 0x25c   : > { %v880_v23 = vpop.permute.xlu1 %879  ;;  %v873_v1 = vmul.f32 %v871_v61, %v866_v11  ;;  %v874_v40 = vmul.f32 %v871_v61, %v867_v42 }
 0x25d   : > { %v881_v24 = vsel %vm396_vm3, %v878_v12, %v880_v23  ;;  %v882_v49 = vsel %vm396_vm3, %v880_v23, %v878_v12 }
 0x25e   : > { %v883_v10 = vmul.f32 %v882_v49, %v1932_v35  ;;  %v884_v63 = vmul.f32 %v881_v24, %v2573_v50  ;;  %v925_v49 = vmul.f32 %v2280_v30, %v2084_v33 }
 0x260   : > { %v889_v43 = vmul.f32 %v887_v2, %v883_v10  ;;  %v890_v38 = vmul.f32 %v887_v2, %v884_v63  ;;  %v894_v53 = vpop.permute.xlu1 %893  ;;  %v938_v2 = vpop.permute.xlu0 %937 }
 0x262   : > { %v891_v9 = vadd.f32 %v889_v43, %v873_v1  ;;  %v892_v0 = vadd.f32 %v890_v38, %v874_v40  ;;  %v931_v40 = vmul.f32 %v929_v8, %v925_v49 }
 0x264   : > { %v896_v21 = vpop.permute.xlu1 %895  ;;  %v952_v38 = vpop.permute.xlu0 %951 }
 0x265   : > { %v897_v28 = vsel %vm424_vm4, %v894_v53, %v896_v21  ;;  %v898_v55 = vsel %vm424_vm4, %v896_v21, %v894_v53 }
 0x266   : > { %v899_v41 = vmul.f32 %v898_v55, %v2074_v29  ;;  %v900_v54 = vmul.f32 %v897_v28, %v2574_v15 }
 0x268   : > { %v905_v57 = vmul.f32 %v903_v52, %v899_v41  ;;  %v906_v3 = vmul.f32 %v903_v52, %v900_v54  ;;  %v910_v47 = vpop.permute.xlu1 %909  ;;  %v926_v52 = vmul.f32 %v2283_v37, %v2087_v34 }
 0x26a   : > { %v907_v61 = vadd.f32 %v905_v57, %v891_v9  ;;  %v908_v22 = vadd.f32 %v906_v3, %v892_v0  ;;  %v932_v43 = vmul.f32 %v929_v8, %v926_v52  ;;  %v970_v57 = vpop.permute.xlu0 %969 }
 0x26c   : > { %v912_v12 = vpop.permute.xlu1 %911 }
 0x26d   : > { %v913_v11 = vsel %vm452_vm5, %v910_v47, %v912_v12  ;;  %v914_v42 = vsel %vm452_vm5, %v912_v12, %v910_v47 }
 0x26e   : > { %v915_v23 = vmul.f32 %v914_v42, %v2100_v44  ;;  %v916_v24 = vmul.f32 %v913_v11, %v2103_v45 }
 0x270   : > { %v921_v10 = vmul.f32 %v919_v39, %v915_v23  ;;  %v922_v63 = vmul.f32 %v919_v39, %v916_v24  ;;  %v936_v1 = vpop.permute.xlu1 %935 }
 0x271   : > { %v939_v55 = vsel %vm511_vm6, %v936_v1, %v938_v2  ;;  %v940_v41 = vsel %vm511_vm6, %v938_v2, %v936_v1 }
 0x272   : > { %v923_v53 = vadd.f32 %v921_v10, %v907_v61  ;;  %v924_v9 = vadd.f32 %v922_v63, %v908_v22  ;;  %v941_v8 = vmul.f32 %v939_v55, %v2119_v56  ;;  %v942_v3 = vmul.f32 %v940_v41, %v2131_v19 }
 0x274   : > { %v934_v0 = vadd.f32 %v932_v43, %v924_v9  ;;  %v933_v21 = vadd.f32 %v931_v40, %v923_v53  ;;  %v954_v28 = vpop.permute.xlu1 %953  ;;  %v947_v11 = vmul.f32 %v2326_v58, %v941_v8  ;;  %v948_v42 = vmul.f32 %v2326_v58, %v942_v3  ;;  %v2576_v3 = vld [vmem:[#allocation17_spill] sm:$0xff] }
 0x275   : > { %v955_v54 = vsel %vm539_vm7, %v952_v38, %v954_v28  ;;  %v956_v39 = vsel %vm539_vm7, %v954_v28, %v952_v38 }
 0x276   : > { %v957_v2 = vmul.f32 %v955_v54, %v2138_v48  ;;  %v958_v12 = vmul.f32 %v956_v39, %v2149_v32  ;;  %v949_v63 = vadd.f32 %v947_v11, %v933_v21  ;;  %v950_v1 = vadd.f32 %v948_v42, %v934_v0 }
 0x278   : > { %v968_v47 = vpop.permute.xlu1 %967  ;;  %v963_v52 = vmul.f32 %v2322_v6, %v957_v2  ;;  %v964_v10 = vmul.f32 %v2322_v6, %v958_v12 }
 0x279   : > { %v971_v61 = vsel %vm567_vm8, %v968_v47, %v970_v57  ;;  %v972_v22 = vsel %vm567_vm8, %v970_v57, %v968_v47 }
 0x27a   : > { %v973_v23 = vmul.f32 %v971_v61, %v2186_v31  ;;  %v974_v24 = vmul.f32 %v972_v22, %v2189_v7  ;;  %v965_v55 = vadd.f32 %v963_v52, %v949_v63  ;;  %v966_v41 = vadd.f32 %v964_v10, %v950_v1 }
 0x27c   : > { %v984_v49 = vpop.permute.xlu1 %983  ;;  %v979_v40 = vmul.f32 %v2336_v51, %v973_v23  ;;  %v980_v43 = vmul.f32 %v2336_v51, %v974_v24 }
 0x27e   : > { %v981_v6 = vadd.f32 %v979_v40, %v965_v55  ;;  %v982_v21 = vadd.f32 %v980_v43, %v966_v41 }
 0x280   : > { %v986_v38 = vpop.permute.xlu1 %985 }
 0x281   : > { %v987_v53 = vsel %vm595_vm9, %v984_v49, %v986_v38  ;;  %v988_v58 = vsel %vm595_vm9, %v986_v38, %v984_v49 }
 0x282   : > { %v989_v9 = vmul.f32 %v987_v53, %v2226_v13  ;;  %v990_v28 = vmul.f32 %v988_v58, %v2229_v46 }
 0x284   : > { %v995_v0 = vmul.f32 %v2346_v60, %v989_v9  ;;  %v996_v54 = vmul.f32 %v2346_v60, %v990_v28  ;;  %v2575_v60 = vld [vmem:[#allocation16_spill] sm:$0xff] }
 0x286   : > { %v2408_v51 = vadd.f32 %v995_v0, %v981_v6  ;;  %v2410_v39 = vadd.f32 %v996_v54, %v982_v21 }
 0x2a7   : > { %v853_v57 = vpop.f32.mrf.mxu1 }
 0x2a8   : > { %1040 = vrot.lane.b32.xlu1 %v853_v57, %s1640_s10  ;;  %1007 = vrot.lane.b32.xlu0 %v853_v57, %s1636_s21 }
 0x2a9   : > { %v855_v8 = vpop.f32.mrf.mxu1 }
 0x2ac   : > { %1056 = vrot.lane.b32.xlu1 %v853_v57, %s1642_s12  ;;  %1024 = vrot.lane.b32.xlu0 %v853_v57, %s1639_s23 }
 0x2b0   : > { %1082 = vrot.lane.b32.xlu1 %v853_v57, %s1644_s13  ;;  %1114 = vrot.lane.b32.xlu0 %v853_v57, %s1649_s28 }
 0x2b4   : > { %1098 = vrot.lane.b32.xlu1 %v853_v57, %s1646_s14  ;;  %1084 = vrot.lane.b32.xlu0 %v855_v8, %s1644_s13 }
 0x2b8   : > { %1130 = vrot.lane.b32.xlu0 %v853_v57, %s1651_s29  ;;  %1009 = vrot.lane.b32.xlu1 %v855_v8, %s1636_s21  ;;  %s1166_s21 = scalar_lea.sflag [#allocation4], %s1805_s11 }
 0x2bc   : > { %1000 = vperm.xlu0 %1441, %v2575_v60   ;;  %1026 = vrot.lane.b32.xlu1 %v855_v8, %s1639_s23  ;;  %s1551_s23 = scalar_lea.vmem %s1181_s26, 128 }
 0x2bd   : > { %p1552_p4 = scmp.ne.s32.totalorder %s1181_s26, %s1551_s23 }
 0x2bf   : > { %p1553_p12 = pnand %p1552_p4, %p2577_p6 }
 0x2c0   : > { %1042 = vrot.lane.b32.xlu1 %v855_v8, %s1640_s10 }
 0x2c1   : > { %p1554_p0 = pneg %p1553_p12 }
 0x2c4   : > { %1058 = vrot.lane.b32.xlu1 %v855_v8, %s1642_s12 }
 0x2c8   : > { %1100 = vrot.lane.b32.xlu1 %v855_v8, %s1646_s14 }
 0x2cc   : > { %1116 = vrot.lane.b32.xlu1 %v855_v8, %s1649_s28 }
 0x2d0   : > { %1132 = vrot.lane.b32.xlu1 %v855_v8, %s1651_s29 }
 0x2d4   : > { %1147 = vperm.xlu1 %1442, %v2576_v3  }
 0x31a   : > { %v1041_v47 = vpop.permute.xlu1 %1040  ;;  %v1008_v2 = vpop.permute.xlu0 %1007 }
 0x31e   : > { %v1057_v61 = vpop.permute.xlu1 %1056  ;;  %v1025_v42 = vpop.permute.xlu0 %1024 }
 0x322   : > { %v1083_v22 = vpop.permute.xlu1 %1082  ;;  %v1115_v40 = vpop.permute.xlu0 %1114 }
 0x326   : > { %v1099_v12 = vpop.permute.xlu1 %1098 }
 0x32a   : > { %v1010_v11 = vpop.permute.xlu1 %1009 }
 0x32b   : > { %v1011_v24 = vsel %vm367_vm2, %v1008_v2, %v1010_v11  ;;  %v1012_v49 = vsel %vm367_vm2, %v1010_v11, %v1008_v2 }
 0x32c   : > { %v1013_v43 = vmul.f32 %v1012_v49, %v1919_v26  ;;  %v1014_v38 = vmul.f32 %v1011_v24, %v1922_v27 }
 0x32e   : > { %v1027_v23 = vpop.permute.xlu1 %1026  ;;  %v1020_v41 = vmul.f32 %v2330_v16, %v1013_v43  ;;  %v1021_v26 = vmul.f32 %v2330_v16, %v1014_v38  ;;  %v1072_v16 = vmul.f32 %v853_v57, %v2084_v33 }
 0x32f   : > { %v1028_v52 = vsel %vm396_vm3, %v1025_v42, %v1027_v23  ;;  %v1029_v10 = vsel %vm396_vm3, %v1027_v23, %v1025_v42 }
 0x330   : > { %v1030_v63 = vmul.f32 %v1029_v10, %v1932_v35  ;;  %v1031_v1 = vmul.f32 %v1028_v52, %v2573_v50 }
 0x332   : > { %v1043_v53 = vpop.permute.xlu1 %1042  ;;  %v1036_v28 = vmul.f32 %v2334_v17, %v1030_v63  ;;  %v1037_v55 = vmul.f32 %v2334_v17, %v1031_v1  ;;  %v1085_v17 = vpop.permute.xlu0 %1084 }
 0x333   : > { %v1044_v58 = vsel %vm424_vm4, %v1041_v47, %v1043_v53  ;;  %v1045_v9 = vsel %vm424_vm4, %v1043_v53, %v1041_v47  ;;  %v1073_v47 = vmul.f32 %v855_v8, %v2087_v34  ;;  %v1087_v24 = vsel %vm511_vm6, %v1085_v17, %v1083_v22 }
 0x334   : > { %v1046_v35 = vmul.f32 %v1045_v9, %v2074_v29  ;;  %v1047_v50 = vmul.f32 %v1044_v58, %v2574_v15  ;;  %v1038_v60 = vadd.f32 %v1036_v28, %v1020_v41  ;;  %v1039_v29 = vadd.f32 %v1037_v55, %v1021_v26 }
 0x335   : > { %v1089_v33 = vmul.f32 %v1087_v24, %v2131_v19  ;;  %v1078_v34 = vmul.f32 %v2332_v18, %v1072_v16  ;;  %v1079_v57 = vmul.f32 %v2332_v18, %v1073_v47  ;;  %v1444_v47 = vld [vmem:[%s1811_s25] sm:$0xff]  ;;  %s1557_s25 = scalar_lea.vmem %s1556_s20, 256 }
 0x336   : > { %v1052_v27 = vmul.f32 %v2324_v62, %v1046_v35  ;;  %v1053_v6 = vmul.f32 %v2324_v62, %v1047_v50  ;;  %v1059_v21 = vpop.permute.xlu1 %1058  ;;  %v1131_v18 = vpop.permute.xlu0 %1130  ;;  %p1559_p3 = scmp.lt.s32.totalorder %s1557_s25, %s1551_s23 }
 0x337   : > { %v1060_v0 = vsel %vm452_vm5, %v1057_v61, %v1059_v21  ;;  %v1061_v54 = vsel %vm452_vm5, %v1059_v21, %v1057_v61  ;;  %v1086_v61 = vsel %vm511_vm6, %v1083_v22, %v1085_v17  ;;  %v1095_v1 = vmul.f32 %v2338_v59, %v1089_v33 }
 0x338   : > { %v1062_v15 = vmul.f32 %v1061_v54, %v2100_v44  ;;  %v1063_v3 = vmul.f32 %v1060_v0, %v2103_v45  ;;  %v1054_v2 = vadd.f32 %v1052_v27, %v1038_v60  ;;  %v1055_v62 = vadd.f32 %v1053_v6, %v1039_v29  ;;  %p1560_p7 = por %p1559_p3, %p1558_p5 }
 0x339   : > { %v1088_v45 = vmul.f32 %v1086_v61, %v2119_v56 }
 0x33a   : > { %v1068_v11 = vmul.f32 %v2328_v14, %v1062_v15  ;;  %v1069_v42 = vmul.f32 %v2328_v14, %v1063_v3  ;;  %v1101_v23 = vpop.permute.xlu1 %1100  ;;  %v1001_v21 = vpop.permute.xlu0 %1000  ;;  %p1561_p9 = pnand %p1560_p7, %p1554_p0 }
 0x33b   : > { %v1102_v14 = vsel %vm539_vm7, %v1099_v12, %v1101_v23  ;;  %v1103_v52 = vsel %vm539_vm7, %v1101_v23, %v1099_v12  ;;  %v1094_v19 = vmul.f32 %v2338_v59, %v1088_v45  ;;  %v1004_v54 = vadd.f32 %v1001_v21, %v2410_v39 }
 0x33c   : > { %v1070_v44 = vadd.f32 %v1068_v11, %v1054_v2  ;;  %v1071_v49 = vadd.f32 %v1069_v42, %v1055_v62  ;;  %v1104_v43 = vmul.f32 %v1102_v14, %v2138_v48  ;;  %v1105_v38 = vmul.f32 %v1103_v52, %v2149_v32 }
 0x33e   : > { %v1117_v8 = vpop.permute.xlu1 %1116  ;;  %v1080_v10 = vadd.f32 %v1078_v34, %v1070_v44  ;;  %v1081_v63 = vadd.f32 %v1079_v57, %v1071_v49  ;;  %v1110_v59 = vmul.f32 %v2342_v36, %v1104_v43  ;;  %v1111_v35 = vmul.f32 %v2342_v36, %v1105_v38 }
 0x33f   : > { %v1118_v22 = vsel %vm567_vm8, %v1115_v40, %v1117_v8  ;;  %v1119_v56 = vsel %vm567_vm8, %v1117_v8, %v1115_v40 }
 0x340   : > { %v1120_v9 = vmul.f32 %v1118_v22, %v2186_v31  ;;  %v1121_v40 = vmul.f32 %v1119_v56, %v2189_v7  ;;  %v1096_v28 = vadd.f32 %v1094_v19, %v1080_v10  ;;  %v1097_v55 = vadd.f32 %v1095_v1, %v1081_v63 }
 0x342   : > { %v1133_v53 = vpop.permute.xlu1 %1132  ;;  %v1126_v50 = vmul.f32 %v2340_v25, %v1120_v9  ;;  %v1127_v41 = vmul.f32 %v2340_v25, %v1121_v40  ;;  %v1112_v20 = vadd.f32 %v1110_v59, %v1096_v28  ;;  %v1113_v26 = vadd.f32 %v1111_v35, %v1097_v55 }
 0x343   : > { %v1134_v12 = vsel %vm595_vm9, %v1131_v18, %v1133_v53  ;;  %v1135_v58 = vsel %vm595_vm9, %v1133_v53, %v1131_v18 }
 0x344   : > { %v1136_v48 = vmul.f32 %v1134_v12, %v2226_v13  ;;  %v1137_v32 = vmul.f32 %v1135_v58, %v2229_v46  ;;  %v1128_v27 = vadd.f32 %v1126_v50, %v1112_v20  ;;  %v1129_v6 = vadd.f32 %v1127_v41, %v1113_v26 }
 0x345   : > { %v1003_v46 = vadd.f32 %v1001_v21, %v2408_v51 }
 0x346   : > { %v1142_v31 = vmul.f32 %v2344_v5, %v1136_v48  ;;  %v1143_v7 = vmul.f32 %v2344_v5, %v1137_v32 }
 0x348   : > { %v1144_v36 = vadd.f32 %v1142_v31, %v1128_v27  ;;  %v1145_v13 = vadd.f32 %v1143_v7, %v1129_v6 }
 0x34f   : > { %v1148_v0 = vpop.permute.xlu1 %1147 }
 0x350   : > { %v1150_v25 = vadd.f32 %v1148_v0, %v1144_v36  ;;  %v1151_v17 = vadd.f32 %v1148_v0, %v1145_v13 }
 0x352   : > { %v1152_v60 = vadd.f32 %v1150_v25, %v1003_v46  ;;  %v1153_v29 = vadd.f32 %v1151_v17, %v1004_v54 }
 0x354   : > { %v1154_v5 = vadd.f32 %v1152_v60, %v2280_v30  ;;  %v1155_v15 = vadd.f32 %v1153_v29, %v2283_v37 }
 0x356   : > { %v1156_v3 = vmax.f32 %v1154_v5, 0.0  ;;  %v1157_v16 = vmax.f32 %v1155_v15, 0.0 }
 0x358   : > { %v1158_v51 = vadd.f32 %v1444_v47, %v1156_v3  ;;  %v1159_v39 = vadd.f32 %v1157_v16, %v1834_v4 }
 0x35a   : > { %v1162_v2 = vcombine.low %v1158_v51, %v1159_v39 }
 0x35c   : > { %1164 = vst [vmem:[%s257_s30] sm:$0xff] %v1162_v2 }
 0x35d   : > { %1564 = shalt.err (!%p1561_p9)
}
 0x35e   : > { %s1565_s10 = scalar_lea.hbm %s1178_s24, 128  ;;  %s1569_s13 = scalar_lea.hbm %s2545_s4, 256 }
 0x35f   : > { %p1566_p13 = scmp.ne.s32.totalorder %s1178_s24, %s1565_s10  ;;  %p1570_p11 = scmp.lt.s32.totalorder %s1178_s24, %s2545_s4 }
 0x360   : > { %p1571_p1 = scmp.lt.s32.totalorder %s1569_s13, %s1565_s10 }
 0x361   : > { %p1567_p8 = pnand %p1566_p13, %p2577_p6 }
 0x362   : > { %p1572_p2 = por %p1571_p1, %p1570_p11 }
 0x363   : > { %p1568_p10 = pneg %p1567_p8 }
 0x365   : > { %p1573_p4 = pnand %p1572_p2, %p1568_p10 }
 0x367   : > { %1576 = shalt.err (!%p1573_p4)
}
 0x368   : > { %1321 = dma.vmem_to_hbm [thread:$0]  (%p2577_p6), %s1181_s26, 128, %s1178_s24, %s1166_s21  }
 0x369 PF: > { %s1192_s29 = sand.u32 1, %s1611_s15   ;;  %p2578_p12 = scmp.ne.s32.totalorder %s2557_s22, 0 }
 0x36a   : > { %p2579_p0 = scmp.ge.s32.totalorder %s1623_s18, 2  ;;  %s1193_s7 = scalar_lea.sflag [#allocation4], %s1192_s29 }
 0x36c   : > { %p1338_p5 = pnand %p2579_p0, %p2578_p12 }
 0x36e   : > { %p1339_p3 = pneg %p1338_p5 }
 0x370   : > { %1606 = dma.done.wait (%p1339_p3), %s1193_s7, 128  }
 0x371   : > { %1608 = vsyncadd (%p1339_p3), %s1193_s7, 4294967168  ;;  %p19_p7 = scmp.ge.s32.totalorder %s1759_s27, 4   ;;  %s2580_s15 = smov %s1615_s16 }
 0x372   : > { %s2581_s16 = smov %s1619_s17  ;;  %s2582_s17 = smov %s1769_s5 }
 0x373   : > { %s2583_s18 = smov %s1759_s27  ;;  %21 = sbr.rel (!%p19_p7) target bundleno = 7 (0x7), region = 105 }
 0x378   :  { %1198 = vsyncpa [#allocation3], 1 }
 0x379   :  { %1200 = vsyncpa [#allocation3 + $0x1], 1 }
 0x37a   :  { %1201 = vsyncpa [#allocation6], 1 }
 0x37b   :  { %1202 = vsyncpa [#allocation9], 1 }
 0x37c   :  { %1203 = vsyncpa [#allocation4], 1 }
 0x37d   :  { %1205 = vsyncpa [#allocation4 + $0x1], 1 }

</bundles_post_ra>
